<compile_context>
chip_gen: v5e
topology: v5e:2x2
jax: 0.10.0
libtpu: 0.0.40
codegen_flags: <defaults>
</compile_context>

<pallas_src>
import math
import numpy as np

import jax
import jax.numpy as jnp
from jax.experimental import pallas as pl
from jax.experimental.pallas import tpu as pltpu


# ---------------------------------------------------------------------------
# Kernel: whole 4-layer forward in a single invocation (no grid).
# ---------------------------------------------------------------------------
def _convnet_fused_kernel(a0_ref,
                          d1_ref, f1_ref, b1_ref,
                          d2_ref, f2_ref, b2_ref,
                          d3_ref, f3_ref, b3_ref,
                          d4_ref, f4_ref, b4_ref,
                          o_ref):
    a = a0_ref[...]                                   # (H0, W0*N*C) bf16
    act_f32 = None
    for d_ref, f_ref, b_ref in ((d1_ref, f1_ref, b1_ref),
                                (d2_ref, f2_ref, b2_ref),
                                (d3_ref, f3_ref, b3_ref),
                                (d4_ref, f4_ref, b4_ref)):
        kh_taps, h_out, _ = d_ref.shape
        l_out = f_ref.shape[2]
        acc = jnp.zeros((h_out, l_out), jnp.float32)
        for kh in range(kh_taps):                     # static unroll
            # Row selection (one-hot matrix -> exact), stride + vertical tap.
            rows = jnp.dot(d_ref[kh], a,
                           preferred_element_type=jnp.float32).astype(jnp.bfloat16)
            # Horizontal taps + channel mixing, accumulated in f32 on the MXU.
            acc = acc + jnp.dot(rows, f_ref[kh],
                                preferred_element_type=jnp.float32)
        act_f32 = jnp.maximum(acc + b_ref[...], 0.0)  # bias + ReLU (VPU)
        a = act_f32.astype(jnp.bfloat16)              # feed next layer (VMEM)
    o_ref[...] = act_f32                              # (H_L, W_L*N*C) f32


# ---------------------------------------------------------------------------
# Host-side: precompute the tiny per-layer operator matrices.
# ---------------------------------------------------------------------------
def _layer_operators(w, b, stride, h_in, w_in, n_batch):
    """Builds D (k_h, H_out, H_in), F (k_h, W_in*N*Cin, W_out*N*Cout), bias row."""
    w_np = np.asarray(w, np.float32)                  # (Cout, Cin, KH, KW)
    b_np = np.asarray(b, np.float32)                  # (Cout,)
    c_out, c_in, k_h, k_w = w_np.shape
    h_out = (h_in - k_h) // stride + 1
    w_out = (w_in - k_w) // stride + 1
    l_in = w_in * n_batch * c_in
    l_out = w_out * n_batch * c_out

    d_op = np.zeros((k_h, h_out, h_in), np.float32)
    f_op = np.zeros((k_h, l_in, l_out), np.float32)
    for kh in range(k_h):
        for ho in range(h_out):
            d_op[kh, ho, stride * ho + kh] = 1.0
        for wo in range(w_out):
            for kw in range(k_w):
                wi = stride * wo + kw
                for n in range(n_batch):
                    r0 = (wi * n_batch + n) * c_in
                    c0 = (wo * n_batch + n) * c_out
                    f_op[kh, r0:r0 + c_in, c0:c0 + c_out] = w_np[:, :, kh, kw].T
    bias_row = np.tile(b_np, w_out * n_batch)[None, :]          # (1, l_out)
    ops = (jnp.asarray(d_op, jnp.bfloat16),
           jnp.asarray(f_op, jnp.bfloat16),
           jnp.asarray(bias_row, jnp.float32))
    return ops, (h_out, w_out)


def build_fused_forward(params, x_shape):
    n_batch, c_in0, h0, w0 = x_shape
    flat_ops = []
    h_l, w_l = h0, w0
    flops = 0
    bytes_accessed = h0 * w0 * n_batch * c_in0 * 2              # bf16 input
    for (wgt, bias, stride) in params:
        (d_op, f_op, b_op), (h_o, w_o) = _layer_operators(
            wgt, bias, stride, h_l, w_l, n_batch)
        flat_ops += [d_op, f_op, b_op]
        k_h, h_out_, h_in_ = d_op.shape
        _, l_in_, l_out_ = f_op.shape
        flops += k_h * (2 * h_out_ * h_in_ * l_in_ + 2 * h_out_ * l_in_ * l_out_)
        bytes_accessed += d_op.size * 2 + f_op.size * 2 + b_op.size * 4
        h_l, w_l = h_o, w_o
    c_out = params[-1][0].shape[0]
    a0_shape = (h0, w0 * n_batch * c_in0)
    out_shape = (h_l, w_l * n_batch * c_out)
    bytes_accessed += out_shape[0] * out_shape[1] * 4

    def _full_spec(shape):
        rank = len(shape)
        return pl.BlockSpec(shape, lambda rank=rank: (0,) * rank)

    call = pl.pallas_call(
        _convnet_fused_kernel,
        out_shape=jax.ShapeDtypeStruct(out_shape, jnp.float32),
        in_specs=[_full_spec(a0_shape)] + [_full_spec(t.shape) for t in flat_ops],
        out_specs=_full_spec(out_shape),
        compiler_params=pltpu.CompilerParams(vmem_limit_bytes=32 * 1024 * 1024),
        cost_estimate=pl.CostEstimate(flops=int(flops), transcendentals=0,
                                      bytes_accessed=int(bytes_accessed)),
    )

    @jax.jit
    def forward(x):
        # Single layout conversion at the model boundary (NCHW -> (H, W*N*C)).
        a0 = x.transpose(2, 3, 0, 1).reshape(a0_shape).astype(jnp.bfloat16)
        out = call(a0, *flat_ops)
        # Back to NCHW only once, at the output boundary.
        return out.reshape(h_l, w_l, n_batch, c_out).transpose(2, 3, 0, 1)

    return forward


# ---------------------------------------------------------------------------
# Module parameters (mirrors ConvNet.__init__, quirks reproduced faithfully:
# every layer is inp_channels -> hidden[0]; growth_func output is unused).
# ---------------------------------------------------------------------------
def init_convnet_params(key, inp_channels, init_channels, growth_func):
    num_layers = 4
    hidden = [init_channels]
    for _ in range(num_layers - 1):
        hidden.append(growth_func(hidden[-1]))
    cfgs = [(inp_channels, hidden[0], 5, 2),
            (inp_channels, hidden[0], 3, 2),
            (inp_channels, hidden[0], 3, 2),
            (inp_channels, hidden[0], 3, 1)]
    params = []
    for cin, cout, k, s in cfgs:
        key, kw_, kb_ = jax.random.split(key, 3)
        fan_in = cin * k * k
        bound = 1.0 / math.sqrt(fan_in)   # PyTorch default Conv2d init range
        w = jax.random.uniform(kw_, (cout, cin, k, k), jnp.float32, -bound, bound)
        b = jax.random.uniform(kb_, (cout,), jnp.float32, -bound, bound)
        params.append((w, b, s))
    return params


if __name__ == "__main__":
    key = jax.random.PRNGKey(0)
    kx, kp = jax.random.split(key)

    inp_channels = 4
    init_channels = 4          # must equal inp_channels for the module to compose
    params = init_convnet_params(kp, inp_channels, init_channels, lambda c: 2 * c)

    # 36x36 spatial so all 4 VALID convs (k5 s2, k3 s2, k3 s2, k3 s1) stay
    # positive: 36 -> 16 -> 7 -> 3 -> 1.
    x = jax.random.normal(kx, (2, inp_channels, 36, 36), jnp.float32)

    forward = build_fused_forward(params, x.shape)
    y = jax.block_until_ready(forward(x))

    # Pure-JAX reference of the whole forward pass (f32).
    ref = x
    for w, b, s in params:
        ref = jax.lax.conv_general_dilated(
            ref, w, (s, s), "VALID", dimension_numbers=("NCHW", "OIHW", "NCHW"))
        ref = jnp.maximum(ref + b[None, :, None, None], 0.0)

    assert y.shape == ref.shape == (2, init_channels, 1, 1), (y.shape, ref.shape)
    # Kernel uses bf16 matmul operands (f32 accumulation) vs the f32 reference.
    assert jnp.allclose(y, ref, atol=2e-2, rtol=2e-2), \
        float(jnp.max(jnp.abs(y - ref)))
    print("KERNEL_OK")
</pallas_src>

<mosaic_0001>
module attributes {stable_mosaic.version = 11 : i64} {
  func.func @_convnet_fused_kernel(%arg0: memref<36x288xbf16, #tpu.memory_space<vmem>>, %arg1: memref<5x16x36xbf16, #tpu.memory_space<vmem>>, %arg2: memref<5x288x128xbf16, #tpu.memory_space<vmem>>, %arg3: memref<1x128xf32, #tpu.memory_space<vmem>>, %arg4: memref<3x7x16xbf16, #tpu.memory_space<vmem>>, %arg5: memref<3x128x56xbf16, #tpu.memory_space<vmem>>, %arg6: memref<1x56xf32, #tpu.memory_space<vmem>>, %arg7: memref<3x3x7xbf16, #tpu.memory_space<vmem>>, %arg8: memref<3x56x24xbf16, #tpu.memory_space<vmem>>, %arg9: memref<1x24xf32, #tpu.memory_space<vmem>>, %arg10: memref<3x1x3xbf16, #tpu.memory_space<vmem>>, %arg11: memref<3x24x8xbf16, #tpu.memory_space<vmem>>, %arg12: memref<1x8xf32, #tpu.memory_space<vmem>>, %arg13: memref<1x8xf32, #tpu.memory_space<vmem>>) attributes {dimension_semantics = [], scalar_prefetch = 0 : i64, scratch_operands = 0 : i64, tpu.core_type = #tpu.core_type<tc>} {
    %c0 = arith.constant 0 : index
    %c0_0 = arith.constant 0 : index
    %0 = vector.load %arg0[%c0, %c0_0] : memref<36x288xbf16, #tpu.memory_space<vmem>>, vector<36x288xbf16>
    %cst = arith.constant 0.000000e+00 : f32
    %1 = vector.broadcast %cst : f32 to vector<16x128xf32>
    %c0_1 = arith.constant 0 : index
    %c0_2 = arith.constant 0 : index
    %c0_3 = arith.constant 0 : index
    %2 = vector.load %arg1[%c0_1, %c0_2, %c0_3] : memref<5x16x36xbf16, #tpu.memory_space<vmem>>, vector<1x16x36xbf16>
    %3 = vector.shape_cast %2 : vector<1x16x36xbf16> to vector<16x36xbf16>
    %cst_4 = arith.constant dense<0.000000e+00> : vector<16x288xf32>
    %4 = tpu.matmul %3, %0, %cst_4 {dimension_numbers = #tpu.dot_dimension_numbers<[1], [0], [0], [1], [0, 0, 1, 1], [], []>} : vector<16x36xbf16>, vector<36x288xbf16>, vector<16x288xf32> -> vector<16x288xf32>
    %5 = arith.truncf %4 : vector<16x288xf32> to vector<16x288xbf16>
    %c0_5 = arith.constant 0 : index
    %c0_6 = arith.constant 0 : index
    %c0_7 = arith.constant 0 : index
    %6 = vector.load %arg2[%c0_5, %c0_6, %c0_7] : memref<5x288x128xbf16, #tpu.memory_space<vmem>>, vector<1x288x128xbf16>
    %7 = vector.shape_cast %6 : vector<1x288x128xbf16> to vector<288x128xbf16>
    %cst_8 = arith.constant dense<0.000000e+00> : vector<16x128xf32>
    %8 = tpu.matmul %5, %7, %cst_8 {dimension_numbers = #tpu.dot_dimension_numbers<[1], [0], [0], [1], [0, 0, 1, 1], [], []>} : vector<16x288xbf16>, vector<288x128xbf16>, vector<16x128xf32> -> vector<16x128xf32>
    %9 = arith.addf %1, %8 : vector<16x128xf32>
    %c1 = arith.constant 1 : index
    %c0_9 = arith.constant 0 : index
    %c0_10 = arith.constant 0 : index
    %10 = vector.load %arg1[%c1, %c0_9, %c0_10] : memref<5x16x36xbf16, #tpu.memory_space<vmem>>, vector<1x16x36xbf16>
    %11 = vector.shape_cast %10 : vector<1x16x36xbf16> to vector<16x36xbf16>
    %cst_11 = arith.constant dense<0.000000e+00> : vector<16x288xf32>
    %12 = tpu.matmul %11, %0, %cst_11 {dimension_numbers = #tpu.dot_dimension_numbers<[1], [0], [0], [1], [0, 0, 1, 1], [], []>} : vector<16x36xbf16>, vector<36x288xbf16>, vector<16x288xf32> -> vector<16x288xf32>
    %13 = arith.truncf %12 : vector<16x288xf32> to vector<16x288xbf16>
    %c1_12 = arith.constant 1 : index
    %c0_13 = arith.constant 0 : index
    %c0_14 = arith.constant 0 : index
    %14 = vector.load %arg2[%c1_12, %c0_13, %c0_14] : memref<5x288x128xbf16, #tpu.memory_space<vmem>>, vector<1x288x128xbf16>
    %15 = vector.shape_cast %14 : vector<1x288x128xbf16> to vector<288x128xbf16>
    %cst_15 = arith.constant dense<0.000000e+00> : vector<16x128xf32>
    %16 = tpu.matmul %13, %15, %cst_15 {dimension_numbers = #tpu.dot_dimension_numbers<[1], [0], [0], [1], [0, 0, 1, 1], [], []>} : vector<16x288xbf16>, vector<288x128xbf16>, vector<16x128xf32> -> vector<16x128xf32>
    %17 = arith.addf %9, %16 : vector<16x128xf32>
    %c2 = arith.constant 2 : index
    %c0_16 = arith.constant 0 : index
    %c0_17 = arith.constant 0 : index
    %18 = vector.load %arg1[%c2, %c0_16, %c0_17] : memref<5x16x36xbf16, #tpu.memory_space<vmem>>, vector<1x16x36xbf16>
    %19 = vector.shape_cast %18 : vector<1x16x36xbf16> to vector<16x36xbf16>
    %cst_18 = arith.constant dense<0.000000e+00> : vector<16x288xf32>
    %20 = tpu.matmul %19, %0, %cst_18 {dimension_numbers = #tpu.dot_dimension_numbers<[1], [0], [0], [1], [0, 0, 1, 1], [], []>} : vector<16x36xbf16>, vector<36x288xbf16>, vector<16x288xf32> -> vector<16x288xf32>
    %21 = arith.truncf %20 : vector<16x288xf32> to vector<16x288xbf16>
    %c2_19 = arith.constant 2 : index
    %c0_20 = arith.constant 0 : index
    %c0_21 = arith.constant 0 : index
    %22 = vector.load %arg2[%c2_19, %c0_20, %c0_21] : memref<5x288x128xbf16, #tpu.memory_space<vmem>>, vector<1x288x128xbf16>
    %23 = vector.shape_cast %22 : vector<1x288x128xbf16> to vector<288x128xbf16>
    %cst_22 = arith.constant dense<0.000000e+00> : vector<16x128xf32>
    %24 = tpu.matmul %21, %23, %cst_22 {dimension_numbers = #tpu.dot_dimension_numbers<[1], [0], [0], [1], [0, 0, 1, 1], [], []>} : vector<16x288xbf16>, vector<288x128xbf16>, vector<16x128xf32> -> vector<16x128xf32>
    %25 = arith.addf %17, %24 : vector<16x128xf32>
    %c3 = arith.constant 3 : index
    %c0_23 = arith.constant 0 : index
    %c0_24 = arith.constant 0 : index
    %26 = vector.load %arg1[%c3, %c0_23, %c0_24] : memref<5x16x36xbf16, #tpu.memory_space<vmem>>, vector<1x16x36xbf16>
    %27 = vector.shape_cast %26 : vector<1x16x36xbf16> to vector<16x36xbf16>
    %cst_25 = arith.constant dense<0.000000e+00> : vector<16x288xf32>
    %28 = tpu.matmul %27, %0, %cst_25 {dimension_numbers = #tpu.dot_dimension_numbers<[1], [0], [0], [1], [0, 0, 1, 1], [], []>} : vector<16x36xbf16>, vector<36x288xbf16>, vector<16x288xf32> -> vector<16x288xf32>
    %29 = arith.truncf %28 : vector<16x288xf32> to vector<16x288xbf16>
    %c3_26 = arith.constant 3 : index
    %c0_27 = arith.constant 0 : index
    %c0_28 = arith.constant 0 : index
    %30 = vector.load %arg2[%c3_26, %c0_27, %c0_28] : memref<5x288x128xbf16, #tpu.memory_space<vmem>>, vector<1x288x128xbf16>
    %31 = vector.shape_cast %30 : vector<1x288x128xbf16> to vector<288x128xbf16>
    %cst_29 = arith.constant dense<0.000000e+00> : vector<16x128xf32>
    %32 = tpu.matmul %29, %31, %cst_29 {dimension_numbers = #tpu.dot_dimension_numbers<[1], [0], [0], [1], [0, 0, 1, 1], [], []>} : vector<16x288xbf16>, vector<288x128xbf16>, vector<16x128xf32> -> vector<16x128xf32>
    %33 = arith.addf %25, %32 : vector<16x128xf32>
    %c4 = arith.constant 4 : index
    %c0_30 = arith.constant 0 : index
    %c0_31 = arith.constant 0 : index
    %34 = vector.load %arg1[%c4, %c0_30, %c0_31] : memref<5x16x36xbf16, #tpu.memory_space<vmem>>, vector<1x16x36xbf16>
    %35 = vector.shape_cast %34 : vector<1x16x36xbf16> to vector<16x36xbf16>
    %cst_32 = arith.constant dense<0.000000e+00> : vector<16x288xf32>
    %36 = tpu.matmul %35, %0, %cst_32 {dimension_numbers = #tpu.dot_dimension_numbers<[1], [0], [0], [1], [0, 0, 1, 1], [], []>} : vector<16x36xbf16>, vector<36x288xbf16>, vector<16x288xf32> -> vector<16x288xf32>
    %37 = arith.truncf %36 : vector<16x288xf32> to vector<16x288xbf16>
    %c4_33 = arith.constant 4 : index
    %c0_34 = arith.constant 0 : index
    %c0_35 = arith.constant 0 : index
    %38 = vector.load %arg2[%c4_33, %c0_34, %c0_35] : memref<5x288x128xbf16, #tpu.memory_space<vmem>>, vector<1x288x128xbf16>
    %39 = vector.shape_cast %38 : vector<1x288x128xbf16> to vector<288x128xbf16>
    %cst_36 = arith.constant dense<0.000000e+00> : vector<16x128xf32>
    %40 = tpu.matmul %37, %39, %cst_36 {dimension_numbers = #tpu.dot_dimension_numbers<[1], [0], [0], [1], [0, 0, 1, 1], [], []>} : vector<16x288xbf16>, vector<288x128xbf16>, vector<16x128xf32> -> vector<16x128xf32>
    %41 = arith.addf %33, %40 : vector<16x128xf32>
    %c0_37 = arith.constant 0 : index
    %c0_38 = arith.constant 0 : index
    %42 = vector.load %arg3[%c0_37, %c0_38] : memref<1x128xf32, #tpu.memory_space<vmem>>, vector<1x128xf32>
    %43 = vector.broadcast %42 : vector<1x128xf32> to vector<16x128xf32>
    %44 = arith.addf %41, %43 : vector<16x128xf32>
    %cst_39 = arith.constant 0.000000e+00 : f32
    %45 = vector.broadcast %cst_39 : f32 to vector<16x128xf32>
    %46 = arith.maximumf %44, %45 : vector<16x128xf32>
    %47 = arith.truncf %46 : vector<16x128xf32> to vector<16x128xbf16>
    %cst_40 = arith.constant 0.000000e+00 : f32
    %48 = vector.broadcast %cst_40 : f32 to vector<7x56xf32>
    %c0_41 = arith.constant 0 : index
    %c0_42 = arith.constant 0 : index
    %c0_43 = arith.constant 0 : index
    %49 = vector.load %arg4[%c0_41, %c0_42, %c0_43] : memref<3x7x16xbf16, #tpu.memory_space<vmem>>, vector<1x7x16xbf16>
    %50 = vector.shape_cast %49 : vector<1x7x16xbf16> to vector<7x16xbf16>
    %cst_44 = arith.constant dense<0.000000e+00> : vector<7x128xf32>
    %51 = tpu.matmul %50, %47, %cst_44 {dimension_numbers = #tpu.dot_dimension_numbers<[1], [0], [0], [1], [0, 0, 1, 1], [], []>} : vector<7x16xbf16>, vector<16x128xbf16>, vector<7x128xf32> -> vector<7x128xf32>
    %52 = arith.truncf %51 : vector<7x128xf32> to vector<7x128xbf16>
    %c0_45 = arith.constant 0 : index
    %c0_46 = arith.constant 0 : index
    %c0_47 = arith.constant 0 : index
    %53 = vector.load %arg5[%c0_45, %c0_46, %c0_47] : memref<3x128x56xbf16, #tpu.memory_space<vmem>>, vector<1x128x56xbf16>
    %54 = vector.shape_cast %53 : vector<1x128x56xbf16> to vector<128x56xbf16>
    %cst_48 = arith.constant dense<0.000000e+00> : vector<7x56xf32>
    %55 = tpu.matmul %52, %54, %cst_48 {dimension_numbers = #tpu.dot_dimension_numbers<[1], [0], [0], [1], [0, 0, 1, 1], [], []>} : vector<7x128xbf16>, vector<128x56xbf16>, vector<7x56xf32> -> vector<7x56xf32>
    %56 = arith.addf %48, %55 : vector<7x56xf32>
    %c1_49 = arith.constant 1 : index
    %c0_50 = arith.constant 0 : index
    %c0_51 = arith.constant 0 : index
    %57 = vector.load %arg4[%c1_49, %c0_50, %c0_51] : memref<3x7x16xbf16, #tpu.memory_space<vmem>>, vector<1x7x16xbf16>
    %58 = vector.shape_cast %57 : vector<1x7x16xbf16> to vector<7x16xbf16>
    %cst_52 = arith.constant dense<0.000000e+00> : vector<7x128xf32>
    %59 = tpu.matmul %58, %47, %cst_52 {dimension_numbers = #tpu.dot_dimension_numbers<[1], [0], [0], [1], [0, 0, 1, 1], [], []>} : vector<7x16xbf16>, vector<16x128xbf16>, vector<7x128xf32> -> vector<7x128xf32>
    %60 = arith.truncf %59 : vector<7x128xf32> to vector<7x128xbf16>
    %c1_53 = arith.constant 1 : index
    %c0_54 = arith.constant 0 : index
    %c0_55 = arith.constant 0 : index
    %61 = vector.load %arg5[%c1_53, %c0_54, %c0_55] : memref<3x128x56xbf16, #tpu.memory_space<vmem>>, vector<1x128x56xbf16>
    %62 = vector.shape_cast %61 : vector<1x128x56xbf16> to vector<128x56xbf16>
    %cst_56 = arith.constant dense<0.000000e+00> : vector<7x56xf32>
    %63 = tpu.matmul %60, %62, %cst_56 {dimension_numbers = #tpu.dot_dimension_numbers<[1], [0], [0], [1], [0, 0, 1, 1], [], []>} : vector<7x128xbf16>, vector<128x56xbf16>, vector<7x56xf32> -> vector<7x56xf32>
    %64 = arith.addf %56, %63 : vector<7x56xf32>
    %c2_57 = arith.constant 2 : index
    %c0_58 = arith.constant 0 : index
    %c0_59 = arith.constant 0 : index
    %65 = vector.load %arg4[%c2_57, %c0_58, %c0_59] : memref<3x7x16xbf16, #tpu.memory_space<vmem>>, vector<1x7x16xbf16>
    %66 = vector.shape_cast %65 : vector<1x7x16xbf16> to vector<7x16xbf16>
    %cst_60 = arith.constant dense<0.000000e+00> : vector<7x128xf32>
    %67 = tpu.matmul %66, %47, %cst_60 {dimension_numbers = #tpu.dot_dimension_numbers<[1], [0], [0], [1], [0, 0, 1, 1], [], []>} : vector<7x16xbf16>, vector<16x128xbf16>, vector<7x128xf32> -> vector<7x128xf32>
    %68 = arith.truncf %67 : vector<7x128xf32> to vector<7x128xbf16>
    %c2_61 = arith.constant 2 : index
    %c0_62 = arith.constant 0 : index
    %c0_63 = arith.constant 0 : index
    %69 = vector.load %arg5[%c2_61, %c0_62, %c0_63] : memref<3x128x56xbf16, #tpu.memory_space<vmem>>, vector<1x128x56xbf16>
    %70 = vector.shape_cast %69 : vector<1x128x56xbf16> to vector<128x56xbf16>
    %cst_64 = arith.constant dense<0.000000e+00> : vector<7x56xf32>
    %71 = tpu.matmul %68, %70, %cst_64 {dimension_numbers = #tpu.dot_dimension_numbers<[1], [0], [0], [1], [0, 0, 1, 1], [], []>} : vector<7x128xbf16>, vector<128x56xbf16>, vector<7x56xf32> -> vector<7x56xf32>
    %72 = arith.addf %64, %71 : vector<7x56xf32>
    %c0_65 = arith.constant 0 : index
    %c0_66 = arith.constant 0 : index
    %73 = vector.load %arg6[%c0_65, %c0_66] : memref<1x56xf32, #tpu.memory_space<vmem>>, vector<1x56xf32>
    %74 = vector.broadcast %73 : vector<1x56xf32> to vector<7x56xf32>
    %75 = arith.addf %72, %74 : vector<7x56xf32>
    %cst_67 = arith.constant 0.000000e+00 : f32
    %76 = vector.broadcast %cst_67 : f32 to vector<7x56xf32>
    %77 = arith.maximumf %75, %76 : vector<7x56xf32>
    %78 = arith.truncf %77 : vector<7x56xf32> to vector<7x56xbf16>
    %cst_68 = arith.constant 0.000000e+00 : f32
    %79 = vector.broadcast %cst_68 : f32 to vector<3x24xf32>
    %c0_69 = arith.constant 0 : index
    %c0_70 = arith.constant 0 : index
    %c0_71 = arith.constant 0 : index
    %80 = vector.load %arg7[%c0_69, %c0_70, %c0_71] : memref<3x3x7xbf16, #tpu.memory_space<vmem>>, vector<1x3x7xbf16>
    %81 = vector.shape_cast %80 : vector<1x3x7xbf16> to vector<3x7xbf16>
    %cst_72 = arith.constant dense<0.000000e+00> : vector<3x56xf32>
    %82 = tpu.matmul %81, %78, %cst_72 {dimension_numbers = #tpu.dot_dimension_numbers<[1], [0], [0], [1], [0, 0, 1, 1], [], []>} : vector<3x7xbf16>, vector<7x56xbf16>, vector<3x56xf32> -> vector<3x56xf32>
    %83 = arith.truncf %82 : vector<3x56xf32> to vector<3x56xbf16>
    %c0_73 = arith.constant 0 : index
    %c0_74 = arith.constant 0 : index
    %c0_75 = arith.constant 0 : index
    %84 = vector.load %arg8[%c0_73, %c0_74, %c0_75] : memref<3x56x24xbf16, #tpu.memory_space<vmem>>, vector<1x56x24xbf16>
    %85 = vector.shape_cast %84 : vector<1x56x24xbf16> to vector<56x24xbf16>
    %cst_76 = arith.constant dense<0.000000e+00> : vector<3x24xf32>
    %86 = tpu.matmul %83, %85, %cst_76 {dimension_numbers = #tpu.dot_dimension_numbers<[1], [0], [0], [1], [0, 0, 1, 1], [], []>} : vector<3x56xbf16>, vector<56x24xbf16>, vector<3x24xf32> -> vector<3x24xf32>
    %87 = arith.addf %79, %86 : vector<3x24xf32>
    %c1_77 = arith.constant 1 : index
    %c0_78 = arith.constant 0 : index
    %c0_79 = arith.constant 0 : index
    %88 = vector.load %arg7[%c1_77, %c0_78, %c0_79] : memref<3x3x7xbf16, #tpu.memory_space<vmem>>, vector<1x3x7xbf16>
    %89 = vector.shape_cast %88 : vector<1x3x7xbf16> to vector<3x7xbf16>
    %cst_80 = arith.constant dense<0.000000e+00> : vector<3x56xf32>
    %90 = tpu.matmul %89, %78, %cst_80 {dimension_numbers = #tpu.dot_dimension_numbers<[1], [0], [0], [1], [0, 0, 1, 1], [], []>} : vector<3x7xbf16>, vector<7x56xbf16>, vector<3x56xf32> -> vector<3x56xf32>
    %91 = arith.truncf %90 : vector<3x56xf32> to vector<3x56xbf16>
    %c1_81 = arith.constant 1 : index
    %c0_82 = arith.constant 0 : index
    %c0_83 = arith.constant 0 : index
    %92 = vector.load %arg8[%c1_81, %c0_82, %c0_83] : memref<3x56x24xbf16, #tpu.memory_space<vmem>>, vector<1x56x24xbf16>
    %93 = vector.shape_cast %92 : vector<1x56x24xbf16> to vector<56x24xbf16>
    %cst_84 = arith.constant dense<0.000000e+00> : vector<3x24xf32>
    %94 = tpu.matmul %91, %93, %cst_84 {dimension_numbers = #tpu.dot_dimension_numbers<[1], [0], [0], [1], [0, 0, 1, 1], [], []>} : vector<3x56xbf16>, vector<56x24xbf16>, vector<3x24xf32> -> vector<3x24xf32>
    %95 = arith.addf %87, %94 : vector<3x24xf32>
    %c2_85 = arith.constant 2 : index
    %c0_86 = arith.constant 0 : index
    %c0_87 = arith.constant 0 : index
    %96 = vector.load %arg7[%c2_85, %c0_86, %c0_87] : memref<3x3x7xbf16, #tpu.memory_space<vmem>>, vector<1x3x7xbf16>
    %97 = vector.shape_cast %96 : vector<1x3x7xbf16> to vector<3x7xbf16>
    %cst_88 = arith.constant dense<0.000000e+00> : vector<3x56xf32>
    %98 = tpu.matmul %97, %78, %cst_88 {dimension_numbers = #tpu.dot_dimension_numbers<[1], [0], [0], [1], [0, 0, 1, 1], [], []>} : vector<3x7xbf16>, vector<7x56xbf16>, vector<3x56xf32> -> vector<3x56xf32>
    %99 = arith.truncf %98 : vector<3x56xf32> to vector<3x56xbf16>
    %c2_89 = arith.constant 2 : index
    %c0_90 = arith.constant 0 : index
    %c0_91 = arith.constant 0 : index
    %100 = vector.load %arg8[%c2_89, %c0_90, %c0_91] : memref<3x56x24xbf16, #tpu.memory_space<vmem>>, vector<1x56x24xbf16>
    %101 = vector.shape_cast %100 : vector<1x56x24xbf16> to vector<56x24xbf16>
    %cst_92 = arith.constant dense<0.000000e+00> : vector<3x24xf32>
    %102 = tpu.matmul %99, %101, %cst_92 {dimension_numbers = #tpu.dot_dimension_numbers<[1], [0], [0], [1], [0, 0, 1, 1], [], []>} : vector<3x56xbf16>, vector<56x24xbf16>, vector<3x24xf32> -> vector<3x24xf32>
    %103 = arith.addf %95, %102 : vector<3x24xf32>
    %c0_93 = arith.constant 0 : index
    %c0_94 = arith.constant 0 : index
    %104 = vector.load %arg9[%c0_93, %c0_94] : memref<1x24xf32, #tpu.memory_space<vmem>>, vector<1x24xf32>
    %105 = vector.broadcast %104 : vector<1x24xf32> to vector<3x24xf32>
    %106 = arith.addf %103, %105 : vector<3x24xf32>
    %cst_95 = arith.constant 0.000000e+00 : f32
    %107 = vector.broadcast %cst_95 : f32 to vector<3x24xf32>
    %108 = arith.maximumf %106, %107 : vector<3x24xf32>
    %109 = arith.truncf %108 : vector<3x24xf32> to vector<3x24xbf16>
    %cst_96 = arith.constant 0.000000e+00 : f32
    %110 = vector.broadcast %cst_96 : f32 to vector<1x8xf32>
    %c0_97 = arith.constant 0 : index
    %c0_98 = arith.constant 0 : index
    %c0_99 = arith.constant 0 : index
    %111 = vector.load %arg10[%c0_97, %c0_98, %c0_99] : memref<3x1x3xbf16, #tpu.memory_space<vmem>>, vector<1x1x3xbf16>
    %112 = vector.shape_cast %111 : vector<1x1x3xbf16> to vector<1x3xbf16>
    %cst_100 = arith.constant dense<0.000000e+00> : vector<1x24xf32>
    %113 = tpu.matmul %112, %109, %cst_100 {dimension_numbers = #tpu.dot_dimension_numbers<[1], [0], [0], [1], [0, 0, 1, 1], [], []>} : vector<1x3xbf16>, vector<3x24xbf16>, vector<1x24xf32> -> vector<1x24xf32>
    %114 = arith.truncf %113 : vector<1x24xf32> to vector<1x24xbf16>
    %c0_101 = arith.constant 0 : index
    %c0_102 = arith.constant 0 : index
    %c0_103 = arith.constant 0 : index
    %115 = vector.load %arg11[%c0_101, %c0_102, %c0_103] : memref<3x24x8xbf16, #tpu.memory_space<vmem>>, vector<1x24x8xbf16>
    %116 = vector.shape_cast %115 : vector<1x24x8xbf16> to vector<24x8xbf16>
    %cst_104 = arith.constant dense<0.000000e+00> : vector<1x8xf32>
    %117 = tpu.matmul %114, %116, %cst_104 {dimension_numbers = #tpu.dot_dimension_numbers<[1], [0], [0], [1], [0, 0, 1, 1], [], []>} : vector<1x24xbf16>, vector<24x8xbf16>, vector<1x8xf32> -> vector<1x8xf32>
    %118 = arith.addf %110, %117 : vector<1x8xf32>
    %c1_105 = arith.constant 1 : index
    %c0_106 = arith.constant 0 : index
    %c0_107 = arith.constant 0 : index
    %119 = vector.load %arg10[%c1_105, %c0_106, %c0_107] : memref<3x1x3xbf16, #tpu.memory_space<vmem>>, vector<1x1x3xbf16>
    %120 = vector.shape_cast %119 : vector<1x1x3xbf16> to vector<1x3xbf16>
    %cst_108 = arith.constant dense<0.000000e+00> : vector<1x24xf32>
    %121 = tpu.matmul %120, %109, %cst_108 {dimension_numbers = #tpu.dot_dimension_numbers<[1], [0], [0], [1], [0, 0, 1, 1], [], []>} : vector<1x3xbf16>, vector<3x24xbf16>, vector<1x24xf32> -> vector<1x24xf32>
    %122 = arith.truncf %121 : vector<1x24xf32> to vector<1x24xbf16>
    %c1_109 = arith.constant 1 : index
    %c0_110 = arith.constant 0 : index
    %c0_111 = arith.constant 0 : index
    %123 = vector.load %arg11[%c1_109, %c0_110, %c0_111] : memref<3x24x8xbf16, #tpu.memory_space<vmem>>, vector<1x24x8xbf16>
    %124 = vector.shape_cast %123 : vector<1x24x8xbf16> to vector<24x8xbf16>
    %cst_112 = arith.constant dense<0.000000e+00> : vector<1x8xf32>
    %125 = tpu.matmul %122, %124, %cst_112 {dimension_numbers = #tpu.dot_dimension_numbers<[1], [0], [0], [1], [0, 0, 1, 1], [], []>} : vector<1x24xbf16>, vector<24x8xbf16>, vector<1x8xf32> -> vector<1x8xf32>
    %126 = arith.addf %118, %125 : vector<1x8xf32>
    %c2_113 = arith.constant 2 : index
    %c0_114 = arith.constant 0 : index
    %c0_115 = arith.constant 0 : index
    %127 = vector.load %arg10[%c2_113, %c0_114, %c0_115] : memref<3x1x3xbf16, #tpu.memory_space<vmem>>, vector<1x1x3xbf16>
    %128 = vector.shape_cast %127 : vector<1x1x3xbf16> to vector<1x3xbf16>
    %cst_116 = arith.constant dense<0.000000e+00> : vector<1x24xf32>
    %129 = tpu.matmul %128, %109, %cst_116 {dimension_numbers = #tpu.dot_dimension_numbers<[1], [0], [0], [1], [0, 0, 1, 1], [], []>} : vector<1x3xbf16>, vector<3x24xbf16>, vector<1x24xf32> -> vector<1x24xf32>
    %130 = arith.truncf %129 : vector<1x24xf32> to vector<1x24xbf16>
    %c2_117 = arith.constant 2 : index
    %c0_118 = arith.constant 0 : index
    %c0_119 = arith.constant 0 : index
    %131 = vector.load %arg11[%c2_117, %c0_118, %c0_119] : memref<3x24x8xbf16, #tpu.memory_space<vmem>>, vector<1x24x8xbf16>
    %132 = vector.shape_cast %131 : vector<1x24x8xbf16> to vector<24x8xbf16>
    %cst_120 = arith.constant dense<0.000000e+00> : vector<1x8xf32>
    %133 = tpu.matmul %130, %132, %cst_120 {dimension_numbers = #tpu.dot_dimension_numbers<[1], [0], [0], [1], [0, 0, 1, 1], [], []>} : vector<1x24xbf16>, vector<24x8xbf16>, vector<1x8xf32> -> vector<1x8xf32>
    %134 = arith.addf %126, %133 : vector<1x8xf32>
    %c0_121 = arith.constant 0 : index
    %c0_122 = arith.constant 0 : index
    %135 = vector.load %arg12[%c0_121, %c0_122] : memref<1x8xf32, #tpu.memory_space<vmem>>, vector<1x8xf32>
    %136 = arith.addf %134, %135 : vector<1x8xf32>
    %cst_123 = arith.constant 0.000000e+00 : f32
    %137 = vector.broadcast %cst_123 : f32 to vector<1x8xf32>
    %138 = arith.maximumf %136, %137 : vector<1x8xf32>
    %c0_124 = arith.constant 0 : index
    %c0_125 = arith.constant 0 : index
    %139 = vector.load %arg13[%c0_124, %c0_125] : memref<1x8xf32, #tpu.memory_space<vmem>>, vector<1x8xf32>
    tpu.vector_store %arg13[%c0_124, %c0_125], %138 {strides = array<i32>} : memref<1x8xf32, #tpu.memory_space<vmem>>, vector<1x8xf32>,
    return
  }
}

</mosaic_0001>

<bundles_post_ra>
// kernel: forward.1
= control target key start
LH: loop header
LB: loop body
LE: loop exit
PB: predicated region body
PF: predicated region fallthrough
CT: control target
= control target key end

     0   :  { %18 = vsyncpa [#allocation3], 0  ;;  %s3730_s0 = inlined_call_operand.vmem [shape: bf16[36,288], index: 0, kind: input, shape index: {}]   ;;  %s3731_s1 = inlined_call_operand.hbm [shape: bf16[5,16,36], index: 1, kind: input, shape index: {}]   ;;  %s3732_s2 = inlined_call_operand.vmem [shape: bf16[5,288,128], index: 2, kind: input, shape index: {}]   ;;  %s3733_s3 = inlined_call_operand.vmem [shape: f32[1,128], index: 3, kind: input, shape index: {}]   ;;  %s3734_s4 = inlined_call_operand.vmem [shape: bf16[3,7,16], index: 4, kind: input, shape index: {}]   ;;  %s3735_s5 = inlined_call_operand.vmem [shape: bf16[3,128,56], index: 5, kind: input, shape index: {}]   ;;  %s3736_s6 = inlined_call_operand.vmem [shape: f32[1,56], index: 6, kind: input, shape index: {}]   ;;  %s3737_s7 = inlined_call_operand.vmem [shape: bf16[3,3,7], index: 7, kind: input, shape index: {}]   ;;  %s3738_s8 = inlined_call_operand.hbm [shape: bf16[3,56,24], index: 8, kind: input, shape index: {}]   ;;  %s3739_s9 = inlined_call_operand.vmem [shape: f32[1,24], index: 9, kind: input, shape index: {}]   ;;  %s3740_s10 = inlined_call_operand.vmem [shape: bf16[3,1,3], index: 10, kind: input, shape index: {}]   ;;  %s3741_s11 = inlined_call_operand.hbm [shape: bf16[3,24,8], index: 11, kind: input, shape index: {}]   ;;  %s3742_s12 = inlined_call_operand.hbm [shape: f32[1,8], index: 12, kind: input, shape index: {}]   ;;  %s3743_s13 = inlined_call_operand.vmem [shape: f32[1,8], index: 13, kind: output, shape index: {}]  }
   0x1   :  { %19 = vsyncpa [#allocation5], 0 }
   0x2   :  { %20 = vsyncpa [#allocation8], 0  ;;  %s52_s27 = sshll.u32 %s3738_s8, 4  ;;  %s3111_s28 = smov [#allocation4]   ;;  %s53_s27 = int_to_ptr.hbm [resolvable:$true] %s52_s27 }
   0x3   :  { %s54_s29 = sshll.u32 %s3111_s28, 4  ;;  %s27_s15 = sshll.u32 %s3731_s1, 4  ;;  %s55_s29 = int_to_ptr.vmem [resolvable:$true] %s54_s29  ;;  %s28_s15 = int_to_ptr.hbm [resolvable:$true] %s27_s15 }
   0x4   :  { %s3112_s16 = smov 64   ;;  %s3113_s17 = smov 4  }
   0x5   :  { %60 = dma.hbm_to_vmem [thread:$0]  %s53_s27, 1344, %s55_s29, [#allocation5], %s3112_s16, %s3112_s16, %s3113_s17  }
   0x6   :  { %s3114_s18 = smov [#allocation2]   ;;  %s69_s22 = sshll.u32 %s3741_s11, 4  ;;  %s70_s22 = int_to_ptr.hbm [resolvable:$true] %s69_s22 }
   0x7   :  { %s29_s19 = sshll.u32 %s3114_s18, 4  ;;  %s83_s24 = sshll.u32 %s3742_s12, 4  ;;  %s30_s19 = int_to_ptr.vmem [resolvable:$true] %s29_s19  ;;  %s84_s24 = int_to_ptr.hbm [resolvable:$true] %s83_s24 }
   0x8   :  { %35 = dma.hbm_to_vmem [thread:$0]  %s28_s15, 640, %s30_s19, [#allocation3], %s3112_s16, %s3112_s16, %s3113_s17  }
   0x9   :  { %s3115_s25 = smov [#allocation6]   ;;  %s3116_s1 = smov [#allocation7]  }
   0xa   :  { %s71_s26 = sshll.u32 %s3115_s25, 4  ;;  %s85_s27 = sshll.u32 %s3116_s1, 4  ;;  %s72_s26 = int_to_ptr.vmem [resolvable:$true] %s71_s26  ;;  %s86_s27 = int_to_ptr.vmem [resolvable:$true] %s85_s27 }
   0xb   :  { %77 = dma.hbm_to_vmem [thread:$0]  %s70_s22, 576, %s72_s26, [#allocation5], %s3112_s16, %s3112_s16, %s3113_s17  }
   0xc   :  { %88 = dma.hbm_to_vmem [thread:$0]  %s84_s24, 16, %s86_s27, [#allocation8]  }
   0xd   :  { %3105 = dma.done.wait [#allocation3], 640  }
   0xe   :  { %3106 = vsyncadd [#allocation3], 4294966656 }
   0xf   :  { %3107 = dma.done.wait [#allocation5], 1920  }
  0x10   :  { %3108 = vsyncadd [#allocation5], 4294965376 }
  0x11   :  { %3109 = dma.done.wait [#allocation8], 16  }
  0x12   :  { %3110 = vsyncadd [#allocation8], 4294967280  ;;  %v114_v0 = vld [vmem:[%s3730_s0 + $0x30] sm:$0x33]  ;;  %vm167_vm0 = vcmask 1041408   ;;  %v2903_v28 = vld [vmem:[%s3732_s2 + $0x108] sm:$0xff] }
  0x13   :  { %v145_v1 = vunpack.c.l.b16 %v114_v0  ;;  %v146_v2 = vunpack.c.h.b16 %v114_v0  ;;  %v2115_v3 = vld [vmem:[%s3730_s0 + $0x18] sm:$0xf]  ;;  %v2866_v4 = vld [vmem:[%s3730_s0 + $0x20] sm:$0xf0]  ;;  %v2865_v7 = vld [vmem:[%s3730_s0 + $0x1c] sm:$0xf] }
  0x14   :  { %v2117_v8 = vld [vmem:[%s3730_s0 + $0x24] sm:$0xf0]  ;;  %v115_v9 = vld [vmem:[%s3730_s0 + $0x38] sm:$0x3]  ;;  %v2103_v13 = vld [vmem:[%s3730_s0] sm:$0xf]  ;;  %v3235_v16 = vor.u32 %v2866_v4, %v2115_v3 }
  0x15   :  { %v154_v5 = vpack.c.b16 %v145_v1, %v145_v1  ;;  %v155_v6 = vpack.c.b16 %v146_v2, %v146_v2  ;;  %v147_v10 = vunpack.c.l.b16 %v115_v9  ;;  %v2863_v14 = vld [vmem:[%s3730_s0 + $0x8] sm:$0xf0]  ;;  %v2862_v15 = vld [vmem:[%s3730_s0 + $0x4] sm:$0xf]  ;;  %v3237_v17 = vor.u32 %v2865_v7, %v2117_v8  ;;  %v2105_v18 = vld [vmem:[%s3730_s0 + $0xc] sm:$0xf0] }
  0x16   :  { %v2123_v20 = vld [vmem:[%s3730_s0 + $0x20] sm:$0xf]  ;;  %v2867_v21 = vld [vmem:[%s3730_s0 + $0x28] sm:$0xf0]  ;;  %v3257_v24 = vor.u32 %v2863_v14, %v2103_v13  ;;  %v3259_v25 = vor.u32 %v2862_v15, %v2105_v18  ;;  %v2111_v26 = vld [vmem:[%s3730_s0 + $0x8] sm:$0xf] }
  0x17   :  { %v3219_v11 = vsel %vm167_vm0, %v154_v5, 0  ;;  %v3222_v12 = vsel %vm167_vm0, %v155_v6, 0  ;;  %v156_v19 = vpack.c.b16 %v147_v10, %v147_v10  ;;  %v3253_v23 = vor.u32 %v2867_v21, %v2123_v20  ;;  %v2864_v27 = vld [vmem:[%s3730_s0 + $0x10] sm:$0xf0]  ;;  %v2887_v30 = vld [vmem:[#allocation2 + $0x8] sm:$0xff]  ;;  %v2895_v32 = vld [vmem:[%s3732_s2 + $0xc8] sm:$0xff] }
  0x18   :  { %182 = vmatpush.bf16.msra.mxu0 %v3219_v11  ;;  %196 = vmatpush.bf16.msra.mxu1 %v3222_v12  ;;  %v2868_v29 = vld [vmem:[#allocation2] sm:$0xff]  ;;  %vm163_vm1 = vcmask 293888   ;;  %v3274_v31 = vor.u32 %v2864_v27, %v2111_v26  ;;  %v2894_v33 = vld [vmem:[%s3732_s2 + $0xc0] sm:$0xff]  ;;  %v2893_v34 = vld [vmem:[%s3732_s2 + $0xb8] sm:$0xff]  ;;  %vm459_vm2 = vcmask 261120   ;;  %vm1412_vm3 = vcmask 130048  }
  0x19   :  { %274 = vmatpush.bf16.msra.mxu3 %v3219_v11  ;;  %v3250_v22 = vsel %vm167_vm0, %v156_v19, 0  ;;  %v2892_v35 = vld [vmem:[%s3732_s2 + $0xb0] sm:$0xff]  ;;  %v2902_v36 = vld [vmem:[%s3732_s2 + $0x100] sm:$0xff]  ;;  %v2891_v37 = vld [vmem:[%s3732_s2 + $0xa8] sm:$0xff]  ;;  %vm1715_vm4 = vcmask 1043456   ;;  %vm1714_vm5 = vcmask 1042432  }
  0x1a   :  { %210 = vmatpush.bf16.msra.mxu2 %v3250_v22  ;;  %v2901_v38 = vld [vmem:[%s3732_s2 + $0xf8] sm:$0xff]  ;;  %v2890_v39 = vld [vmem:[%s3732_s2 + $0xa0] sm:$0xff]  ;;  %v2900_v42 = vld [vmem:[%s3732_s2 + $0xf0] sm:$0xff]  ;;  %vm1710_vm6 = vcmask 56320   ;;  %vm1790_vm7 = vcmask 457728   ;;  %vm1930_vm8 = vcmask 1040384  }
  0x1b   :  { %v2876_v40 = vld [vmem:[%s3732_s2 + $0x38] sm:$0xff]  ;;  %v2875_v44 = vld [vmem:[%s3732_s2 + $0x30] sm:$0xff]  ;;  %v2899_v46 = vld [vmem:[%s3732_s2 + $0xe8] sm:$0xff]  ;;  %vm1926_vm9 = vcmask 23552   ;;  %vm1985_vm10 = vcmask 195584   ;;  %vm2088_vm11 = vcmask 57344  }
  0x1c   :  { %183 = vmatpush.bf16.msra.mxu0 %v3235_v16  ;;  %197 = vmatpush.bf16.msra.mxu1 %v3237_v17  ;;  %v2905_v41 = vld [vmem:[%s3732_s2 + $0x118] sm:$0xff]  ;;  %v2904_v45 = vld [vmem:[%s3732_s2 + $0x110] sm:$0xff]  ;;  %v2874_v49 = vld [vmem:[%s3732_s2 + $0x28] sm:$0xff] }
  0x1d   :  { %275 = vmatpush.bf16.msra.mxu3 %v3235_v16  ;;  %v2889_v43 = vld [vmem:[%s3732_s2 + $0x98] sm:$0xff]  ;;  %v2888_v48 = vld [vmem:[%s3732_s2 + $0x90] sm:$0xff]  ;;  %v2898_v50 = vld [vmem:[%s3732_s2 + $0xe0] sm:$0xff] }
  0x1e   :  { %211 = vmatpush.bf16.msra.mxu2 %v3253_v23  ;;  %v2884_v47 = vld [vmem:[%s3732_s2 + $0x78] sm:$0xff]  ;;  %v2883_v51 = vld [vmem:[%s3732_s2 + $0x70] sm:$0xff]  ;;  %v2873_v52 = vld [vmem:[%s3732_s2 + $0x20] sm:$0xff] }
  0x1f   :  { %v2897_v53 = vld [vmem:[%s3732_s2 + $0xd8] sm:$0xff]  ;;  %v2882_v54 = vld [vmem:[%s3732_s2 + $0x68] sm:$0xff]  ;;  %v2896_v56 = vld [vmem:[%s3732_s2 + $0xd0] sm:$0xff] }
  0x20   :  { %184 = vmatpush.bf16.msra.mxu0 %v3257_v24  ;;  %198 = vmatpush.bf16.msra.mxu1 %v3259_v25  ;;  %v2872_v55 = vld [vmem:[%s3732_s2 + $0x18] sm:$0xff]  ;;  %v2881_v57 = vld [vmem:[%s3732_s2 + $0x60] sm:$0xff]  ;;  %v2871_v58 = vld [vmem:[%s3732_s2 + $0x10] sm:$0xff] }
  0x21   :  { %276 = vmatpush.bf16.msra.mxu3 %v3257_v24  ;;  %v2886_v59 = vld [vmem:[%s3732_s2 + $0x88] sm:$0xff]  ;;  %v2880_v60 = vld [vmem:[%s3732_s2 + $0x58] sm:$0xff]  ;;  %v2885_v62 = vld [vmem:[%s3732_s2 + $0x80] sm:$0xff] }
  0x22   :  { %212 = vmatpush.bf16.msra.mxu2 %v3274_v31  ;;  %v2870_v61 = vld [vmem:[%s3732_s2 + $0x8] sm:$0xff]  ;;  %v2879_v63 = vld [vmem:[%s3732_s2 + $0x50] sm:$0xff]  ;;  %v2869_v2 = vld [vmem:[%s3732_s2] sm:$0xff] }
  0x23   :  { %2125 = vmatmul.msk.bf16.vlgmr.msra.gmra.mxu0 %vm163_vm1, %v2868_v29  ;;  %2126 = vmatmul.msk.bf16.vlgmr.msra.gmra.mxu1 %vm163_vm1, %v2868_v29  ;;  %v2878_v3 = vld [vmem:[%s3732_s2 + $0x48] sm:$0xff]  ;;  %v2877_v4 = vld [vmem:[%s3732_s2 + $0x40] sm:$0xff] }
  0x24   :  { %288 = vmatpush.bf16.msrb.mxu0 %v3222_v12  ;;  %302 = vmatpush.bf16.msrb.mxu1 %v3250_v22  ;;  %v2906_v26 = vld [vmem:[#allocation2 + $0x10] sm:$0xff] }
  0x25   :  { %477 = vmatpush.bf16.msrb.mxu3 %v2903_v28  ;;  %2127 = vmatmul.msk.bf16.vlgmr.msra.gmra.mxu2 %vm163_vm1, %v2868_v29 }
  0x26   :  { %2132 = vmatmul.msk.bf16.vlgmr.msra.gmra.mxu3 %vm163_vm1, %v2887_v30  ;;  %463 = vmatpush.bf16.msrb.mxu2 %v2895_v32  ;;  %v3418_v32 = vld [vmem:[#allocation2 + $0x18] sm:$0xff] }
  0x28   :  { %289 = vmatpush.bf16.msrb.mxu0 %v3237_v17  ;;  %303 = vmatpush.bf16.msrb.mxu1 %v3253_v23 }
  0x29   :  { %478 = vmatpush.bf16.msrb.mxu3 %v2902_v36  ;;  %v2908_v36 = vld [vmem:[%s3732_s2 + $0x128] sm:$0xff] }
  0x2a   :  { %464 = vmatpush.bf16.msrb.mxu2 %v2894_v33  ;;  %v2913_v33 = vld [vmem:[%s3732_s2 + $0x150] sm:$0xff] }
  0x2c   :  { %290 = vmatpush.bf16.msrb.mxu0 %v3259_v25  ;;  %304 = vmatpush.bf16.msrb.mxu1 %v3274_v31 }
  0x2d   :  { %479 = vmatpush.bf16.msrb.mxu3 %v2901_v38  ;;  %v2907_v38 = vld [vmem:[%s3732_s2 + $0x120] sm:$0xff] }
  0x2e   :  { %465 = vmatpush.bf16.msrb.mxu2 %v2893_v34  ;;  %v2920_v34 = vld [vmem:[%s3732_s2 + $0x188] sm:$0xff] }
  0x30   :  { %616 = vmatpush.bf16.msra.mxu1 %v2876_v40  ;;  %497 = vmatpush.bf16.msra.mxu0 %v2905_v41  ;;  %v2933_v40 = vld [vmem:[%s3732_s2 + $0x1e8] sm:$0xff] }
  0x31   :  { %480 = vmatpush.bf16.msrb.mxu3 %v2900_v42  ;;  %v2917_v42 = vld [vmem:[%s3732_s2 + $0x170] sm:$0xff] }
  0x32   :  { %466 = vmatpush.bf16.msrb.mxu2 %v2892_v35 }
  0x33   :  { %2133 = vmatmul.msk.bf16.vlgmr.msrb.gmra.mxu0 %vm163_vm1, %v2887_v30  ;;  %2134 = vmatmul.msk.bf16.vlgmr.msrb.gmra.mxu1 %vm163_vm1, %v2887_v30  ;;  %v2914_v30 = vld [vmem:[%s3732_s2 + $0x158] sm:$0xff] }
  0x34   :  { %617 = vmatpush.bf16.msra.mxu1 %v2875_v44  ;;  %498 = vmatpush.bf16.msra.mxu0 %v2904_v45  ;;  %v2916_v45 = vld [vmem:[%s3732_s2 + $0x168] sm:$0xff] }
  0x35   :  { %481 = vmatpush.bf16.msrb.mxu3 %v2899_v46  ;;  %v2924_v46 = vld [vmem:[%s3732_s2 + $0x1a8] sm:$0xff] }
  0x36   :  { %467 = vmatpush.bf16.msrb.mxu2 %v2891_v37  ;;  %v2919_v37 = vld [vmem:[%s3732_s2 + $0x180] sm:$0xff] }
  0x38   :  { %630 = vmatpush.bf16.msrb.mxu0 %v2884_v47  ;;  %618 = vmatpush.bf16.msra.mxu1 %v2874_v49  ;;  %v2931_v47 = vld [vmem:[%s3732_s2 + $0x1d8] sm:$0xff] }
  0x39   :  { %482 = vmatpush.bf16.msrb.mxu3 %v2898_v50  ;;  %v2915_v50 = vld [vmem:[%s3732_s2 + $0x160] sm:$0xff] }
  0x3a   :  { %468 = vmatpush.bf16.msrb.mxu2 %v2890_v39  ;;  %v2918_v39 = vld [vmem:[%s3732_s2 + $0x178] sm:$0xff] }
  0x3c   :  { %631 = vmatpush.bf16.msrb.mxu0 %v2883_v51  ;;  %619 = vmatpush.bf16.msra.mxu1 %v2873_v52  ;;  %v2923_v51 = vld [vmem:[%s3732_s2 + $0x1a0] sm:$0xff]  ;;  %v2930_v52 = vld [vmem:[%s3732_s2 + $0x1d0] sm:$0xff] }
  0x3d   :  { %483 = vmatpush.bf16.msrb.mxu3 %v2897_v53 }
  0x3e   :  { %469 = vmatpush.bf16.msrb.mxu2 %v2889_v43  ;;  %v2932_v43 = vld [vmem:[%s3732_s2 + $0x1e0] sm:$0xff] }
  0x40   :  { %632 = vmatpush.bf16.msrb.mxu0 %v2882_v54  ;;  %620 = vmatpush.bf16.msra.mxu1 %v2872_v55 }
  0x41   :  { %484 = vmatpush.bf16.msrb.mxu3 %v2896_v56  ;;  %v2929_v56 = vld [vmem:[%s3732_s2 + $0x1c8] sm:$0xff] }
  0x42   :  { %470 = vmatpush.bf16.msrb.mxu2 %v2888_v48 }
  0x44   :  { %633 = vmatpush.bf16.msrb.mxu0 %v2881_v57  ;;  %621 = vmatpush.bf16.msra.mxu1 %v2871_v58 }
  0x45   :  { %674 = vmatpush.bf16.msra.mxu3 %v3219_v11 }
  0x46   :  { %650 = vmatpush.bf16.msra.mxu2 %v2886_v59 }
  0x48   :  { %634 = vmatpush.bf16.msrb.mxu0 %v2880_v60  ;;  %622 = vmatpush.bf16.msra.mxu1 %v2870_v61 }
  0x49   :  { %675 = vmatpush.bf16.msra.mxu3 %v3235_v16 }
  0x4a   :  { %651 = vmatpush.bf16.msra.mxu2 %v2885_v62  ;;  %v2928_v62 = vld [vmem:[%s3732_s2 + $0x1c0] sm:$0xff] }
  0x4c   :  { %635 = vmatpush.bf16.msrb.mxu0 %v2879_v63  ;;  %623 = vmatpush.bf16.msra.mxu1 %v2869_v2  ;;  %v2927_v2 = vld [vmem:[%s3732_s2 + $0x1b8] sm:$0xff] }
  0x4d   :  { %676 = vmatpush.bf16.msra.mxu3 %v3257_v24 }
  0x50   :  { %688 = vmatpush.bf16.msrb.mxu1 %v3222_v12  ;;  %636 = vmatpush.bf16.msrb.mxu0 %v2878_v3 }
  0x54   :  { %689 = vmatpush.bf16.msrb.mxu1 %v3237_v17  ;;  %637 = vmatpush.bf16.msrb.mxu0 %v2877_v4 }
  0x58   :  { %690 = vmatpush.bf16.msrb.mxu1 %v3259_v25 }
  0xa0   :  { %v186_v0 = vpop.f32.mrf.mxu0  ;;  %v200_v1 = vpop.f32.mrf.mxu1 }
  0xa8   :  { %v188_v6 = vpop.f32.mrf.mxu0  ;;  %v202_v7 = vpop.f32.mrf.mxu1 }
  0xa9   :  { %v278_v5 = vpop.f32.mrf.mxu3  ;;  %v219_v8 = vpack.c.bf16 %v188_v6, %v186_v0  ;;  %v214_v15 = vpop.f32.mrf.mxu2  ;;  %v220_v29 = vpack.c.bf16 %v202_v7, %v200_v1  ;;  %v2944_v0 = vld [vmem:[#allocation2 + $0x20] sm:$0xff] }
  0xab   :  { %624 = vmatmul.bf16.vlgmr.msra.gmra.mxu1 %v219_v8 }
  0xac   :  { %896 = vmatpush.bf16.msra.mxu1 %v2924_v46 }
  0xb0   :  { %v292_v13 = vpop.f32.mrf.mxu0  ;;  %v306_v14 = vpop.f32.mrf.mxu1  ;;  %897 = vmatpush.bf16.msra.mxu1 %v2923_v51 }
  0xb1   :  { %v280_v9 = vpop.f32.mrf.mxu3  ;;  %v216_v27 = vpop.f32.mrf.mxu2 }
  0xb2   :  { %v311_v10 = vpack.c.bf16 %v280_v9, %v278_v5  ;;  %v221_v28 = vpack.c.bf16 %v216_v27, %v214_v15  ;;  %v2926_v9 = vld [vmem:[%s3732_s2 + $0x1b0] sm:$0xff]  ;;  %v2943_v27 = vld [vmem:[%s3732_s2 + $0x238] sm:$0xff] }
  0xb4   :  { %471 = vmatmul.bf16.vlgmr.msrb.gmra.mxu2 %v311_v10 }
  0xb5   :  { %702 = vmatpush.bf16.msrb.mxu2 %v3250_v22 }
  0xb8   :  { %v294_v18 = vpop.f32.mrf.mxu0  ;;  %v308_v19 = vpop.f32.mrf.mxu1 }
  0xb9   :  { %703 = vmatpush.bf16.msrb.mxu2 %v3253_v23  ;;  %v312_v20 = vpack.c.bf16 %v294_v18, %v292_v13  ;;  %v313_v21 = vpack.c.bf16 %v308_v19, %v306_v14 }
  0xbb   :  { %485 = vmatmul.bf16.vlgmr.msrb.gmra.mxu3 %v312_v20  ;;  %2243 = vmatmul.msk.bf16.vlgmr.msra.gmra.mxu0 %vm459_vm2, %v313_v21 }
  0xbc   :  { %2322 = vmatmul.msk.bf16.vlgmr.msrb.gmra.mxu1 %vm163_vm1, %v2906_v26  ;;  %862 = vmatpush.bf16.msrb.mxu3 %v2914_v30 }
  0xbd   :  { %704 = vmatpush.bf16.msrb.mxu2 %v3274_v31  ;;  %936 = vmatpush.bf16.msrb.mxu1 %v3222_v12 }
  0xc0   :  { %863 = vmatpush.bf16.msrb.mxu3 %v2913_v33 }
  0xc1   :  { %937 = vmatpush.bf16.msrb.mxu1 %v3237_v17 }
  0xc4   :  { %2316 = vmatmul.msk.bf16.vlgmr.msra.gmra.mxu2 %vm459_vm2, %v221_v28 }
  0xc5   :  { %922 = vmatpush.bf16.msra.mxu2 %v3219_v11  ;;  %938 = vmatpush.bf16.msrb.mxu1 %v3259_v25 }
  0xc9   :  { %923 = vmatpush.bf16.msra.mxu2 %v3235_v16 }
  0xcb   :  { %638 = vmatmul.bf16.vlgmr.msrb.gmra.mxu0 %v220_v29  ;;  %2321 = vmatmul.msk.bf16.vlgmr.msra.gmra.mxu3 %vm163_vm1, %v2906_v26  ;;  %v2942_v29 = vld [vmem:[%s3732_s2 + $0x230] sm:$0xff] }
  0xcd   :  { %924 = vmatpush.bf16.msra.mxu2 %v3257_v24 }
  0xd4   :  { %2323 = vmatmul.msk.bf16.vlgmr.msrb.gmra.mxu2 %vm163_vm1, %v2906_v26 }
  0xd5   :  { %950 = vmatpush.bf16.msrb.mxu2 %v3250_v22 }
  0xd9   :  { %951 = vmatpush.bf16.msrb.mxu2 %v3253_v23 }
  0xdd   :  { %952 = vmatpush.bf16.msrb.mxu2 %v3274_v31 }
  0xe4   :  { %2437 = vmatmul.msk.bf16.vlgmr.msra.gmra.mxu2 %vm163_vm1, %v3418_v32 }
  0xe5   :  { %1170 = vmatpush.bf16.msra.mxu2 %v3219_v11  ;;  %v2912_v11 = vld [vmem:[%s3732_s2 + $0x148] sm:$0xff] }
  0xe6   :  { %864 = vmatpush.bf16.msrb.mxu3 %v2912_v11 }
  0xe9   :  { %1171 = vmatpush.bf16.msra.mxu2 %v3235_v16  ;;  %v2911_v16 = vld [vmem:[%s3732_s2 + $0x140] sm:$0xff] }
  0xea   :  { %865 = vmatpush.bf16.msrb.mxu3 %v2911_v16  ;;  %v2941_v16 = vld [vmem:[%s3732_s2 + $0x228] sm:$0xff] }
  0xed   :  { %1172 = vmatpush.bf16.msra.mxu2 %v3257_v24  ;;  %v2921_v24 = vld [vmem:[%s3732_s2 + $0x190] sm:$0xff] }
  0xf4   :  { %2439 = vmatmul.msk.bf16.vlgmr.msrb.gmra.mxu2 %vm163_vm1, %v3418_v32 }
  0xf5   :  { %1198 = vmatpush.bf16.msrb.mxu2 %v3250_v22  ;;  %v2922_v22 = vld [vmem:[%s3732_s2 + $0x198] sm:$0xff] }
  0xf6   :  { %876 = vmatpush.bf16.msra.mxu0 %v2922_v22  ;;  %v2952_v22 = vld [vmem:[%s3732_s2 + $0x278] sm:$0xff] }
  0xf9   :  { %1199 = vmatpush.bf16.msrb.mxu2 %v3253_v23  ;;  %v2910_v23 = vld [vmem:[%s3732_s2 + $0x138] sm:$0xff] }
  0xfa   :  { %866 = vmatpush.bf16.msrb.mxu3 %v2910_v23  ;;  %877 = vmatpush.bf16.msra.mxu0 %v2921_v24 }
  0xfd   :  { %1200 = vmatpush.bf16.msrb.mxu2 %v3274_v31  ;;  %v2909_v31 = vld [vmem:[%s3732_s2 + $0x130] sm:$0xff] }
  0xfe   :  { %867 = vmatpush.bf16.msrb.mxu3 %v2909_v31  ;;  %878 = vmatpush.bf16.msra.mxu0 %v2920_v34  ;;  %v2940_v31 = vld [vmem:[%s3732_s2 + $0x220] sm:$0xff]  ;;  %v2938_v34 = vld [vmem:[%s3732_s2 + $0x210] sm:$0xff] }
 0x102   :  { %868 = vmatpush.bf16.msrb.mxu3 %v2908_v36  ;;  %879 = vmatpush.bf16.msra.mxu0 %v2919_v37  ;;  %v2937_v36 = vld [vmem:[%s3732_s2 + $0x208] sm:$0xff]  ;;  %v2948_v37 = vld [vmem:[%s3732_s2 + $0x258] sm:$0xff] }
 0x104   :  { %2553 = vmatmul.msk.bf16.vlgmr.msra.gmra.mxu2 %vm163_vm1, %v2944_v0 }
 0x106   :  { %869 = vmatpush.bf16.msrb.mxu3 %v2907_v38  ;;  %880 = vmatpush.bf16.msra.mxu0 %v2918_v39  ;;  %v2936_v38 = vld [vmem:[%s3732_s2 + $0x200] sm:$0xff] }
 0x10a   :  { %1110 = vmatpush.bf16.msra.mxu3 %v2933_v40  ;;  %881 = vmatpush.bf16.msra.mxu0 %v2917_v42  ;;  %v2947_v40 = vld [vmem:[%s3732_s2 + $0x250] sm:$0xff]  ;;  %v2946_v42 = vld [vmem:[%s3732_s2 + $0x248] sm:$0xff] }
 0x10e   :  { %1111 = vmatpush.bf16.msra.mxu3 %v2932_v43  ;;  %882 = vmatpush.bf16.msra.mxu0 %v2916_v45  ;;  %v2934_v43 = vld [vmem:[%s3732_s2 + $0x1f0] sm:$0xff] }
 0x112   :  { %1112 = vmatpush.bf16.msra.mxu3 %v2931_v47  ;;  %883 = vmatpush.bf16.msra.mxu0 %v2915_v50  ;;  %v2960_v47 = vld [vmem:[%s3732_s2 + $0x2b8] sm:$0xff] }
 0x114   :  { %2555 = vmatmul.msk.bf16.vlgmr.msrb.gmra.mxu2 %vm163_vm1, %v2944_v0 }
 0x116   :  { %1113 = vmatpush.bf16.msra.mxu3 %v2930_v52  ;;  %1124 = vmatpush.bf16.msrb.mxu0 %v2941_v16 }
 0x11a   :  { %1114 = vmatpush.bf16.msra.mxu3 %v2929_v56  ;;  %1125 = vmatpush.bf16.msrb.mxu0 %v2940_v31 }
 0x11e   :  { %1115 = vmatpush.bf16.msra.mxu3 %v2928_v62 }
 0x122   :  { %1116 = vmatpush.bf16.msra.mxu3 %v2927_v2 }
 0x126   :  { %1117 = vmatpush.bf16.msra.mxu3 %v2926_v9 }
 0x128   :  { %v625_v35 = vpop.f32.mrf.mxu1 }
 0x130   :  { %v627_v41 = vpop.f32.mrf.mxu1 }
 0x137   :  { %v472_v44 = vpop.f32.mrf.mxu2 }
 0x138   :  { %v500_v48 = vpop.f32.mrf.mxu0 }
 0x139   :  { %v692_v49 = vpop.f32.mrf.mxu1 }
 0x13e   :  { %v486_v54 = vpop.f32.mrf.mxu3 }
 0x13f   :  { %v474_v53 = vpop.f32.mrf.mxu2  ;;  %v487_v55 = vadd.f32 %v486_v54, %v472_v44  ;;  %v2945_v44 = vld [vmem:[%s3732_s2 + $0x240] sm:$0xff]  ;;  %v2962_v54 = vld [vmem:[%s3732_s2 + $0x2c8] sm:$0xff] }
 0x140   :  { %v502_v57 = vpop.f32.mrf.mxu0 }
 0x141   :  { %v501_v58 = vadd.f32 %v500_v48, %v487_v55  ;;  %v694_v59 = vpop.f32.mrf.mxu1 }
 0x142   :  { %v712_v60 = vpack.c.bf16 %v694_v59, %v692_v49  ;;  %v2959_v49 = vld [vmem:[%s3732_s2 + $0x2b0] sm:$0xff]  ;;  %v2957_v59 = vld [vmem:[%s3732_s2 + $0x2a0] sm:$0xff] }
 0x143   :  { %v626_v61 = vadd.f32 %v625_v35, %v501_v58  ;;  %v2949_v35 = vld [vmem:[%s3732_s2 + $0x260] sm:$0xff] }
 0x144   :  { %884 = vmatmul.bf16.vlgmr.msra.gmra.mxu0 %v712_v60 }
 0x146   :  { %v488_v1 = vpop.f32.mrf.mxu3 }
 0x147   :  { %v653_v63 = vpop.f32.mrf.mxu2  ;;  %v489_v3 = vadd.f32 %v488_v1, %v474_v53  ;;  %v2958_v53 = vld [vmem:[%s3732_s2 + $0x2a8] sm:$0xff] }
 0x148   :  { %v639_v4 = vpop.f32.mrf.mxu0 }
 0x149   :  { %v640_v5 = vadd.f32 %v639_v4, %v626_v61  ;;  %v503_v6 = vadd.f32 %v502_v57, %v489_v3 }
 0x14b   :  { %v3506_v7 = vadd.f32 %v653_v63, %v640_v5  ;;  %v628_v8 = vadd.f32 %v627_v41, %v503_v6  ;;  %v2935_v41 = vld [vmem:[%s3732_s2 + $0x1f8] sm:$0xff]  ;;  %v2961_v63 = vld [vmem:[%s3732_s2 + $0x2c0] sm:$0xff]  ;;  %v2955_v5 = vld [vmem:[%s3732_s2 + $0x290] sm:$0xff] }
 0x14e   :  { %v678_v13 = vpop.f32.mrf.mxu3 }
 0x14f   :  { %v655_v10 = vpop.f32.mrf.mxu2 }
 0x150   :  { %v641_v14 = vpop.f32.mrf.mxu0 }
 0x151   :  { %v642_v15 = vadd.f32 %v641_v14, %v628_v8  ;;  %v2953_v8 = vld [vmem:[%s3732_s2 + $0x280] sm:$0xff] }
 0x153   :  { %v3511_v18 = vadd.f32 %v655_v10, %v642_v15 }
 0x156   :  { %v680_v20 = vpop.f32.mrf.mxu3 }
 0x157   :  { %v706_v19 = vpop.f32.mrf.mxu2  ;;  %v711_v21 = vpack.c.bf16 %v680_v20, %v678_v13 }
 0x159   :  { %870 = vmatmul.bf16.vlgmr.msrb.gmra.mxu3 %v711_v21 }
 0x15a   :  { %1358 = vmatpush.bf16.msrb.mxu3 %v2952_v22 }
 0x15f   :  { %v708_v26 = vpop.f32.mrf.mxu2 }
 0x160   :  { %v713_v28 = vpack.c.bf16 %v708_v26, %v706_v19 }
 0x162   :  { %2432 = vmatmul.msk.bf16.vlgmr.msra.gmra.mxu1 %vm459_vm2, %v713_v28  ;;  %v2970_v28 = vld [vmem:[%s3735_s5 + $0x38] sm:$0xff] }
 0x163   :  { %1144 = vmatpush.bf16.msra.mxu1 %v2943_v27 }
 0x167   :  { %v926_v30 = vpop.f32.mrf.mxu2  ;;  %1145 = vmatpush.bf16.msra.mxu1 %v2942_v29 }
 0x16f   :  { %v928_v33 = vpop.f32.mrf.mxu2 }
 0x170   :  { %v959_v11 = vpack.c.bf16 %v928_v33, %v926_v30  ;;  %v2969_v30 = vld [vmem:[%s3735_s5 + $0x30] sm:$0xff] }
 0x172   :  { %2438 = vmatmul.msk.bf16.vlgmr.msrb.gmra.mxu1 %vm163_vm1, %v3418_v32  ;;  %1118 = vmatmul.bf16.vlgmr.msra.gmra.mxu3 %v959_v11 }
 0x173   :  { %1184 = vmatpush.bf16.msrb.mxu1 %v3222_v12  ;;  %v2951_v12 = vld [vmem:[%s3732_s2 + $0x270] sm:$0xff] }
 0x174   :  { %1359 = vmatpush.bf16.msrb.mxu3 %v2951_v12  ;;  %v2967_v12 = vld [vmem:[%s3735_s5 + $0x20] sm:$0xff] }
 0x177   :  { %v954_v23 = vpop.f32.mrf.mxu2  ;;  %1185 = vmatpush.bf16.msrb.mxu1 %v3237_v17  ;;  %v2939_v17 = vld [vmem:[%s3732_s2 + $0x218] sm:$0xff] }
 0x178   :  { %1126 = vmatpush.bf16.msrb.mxu0 %v2939_v17 }
 0x17b   :  { %1186 = vmatpush.bf16.msrb.mxu1 %v3259_v25  ;;  %v2950_v25 = vld [vmem:[%s3732_s2 + $0x268] sm:$0xff] }
 0x17c   :  { %1360 = vmatpush.bf16.msrb.mxu3 %v2950_v25  ;;  %1127 = vmatpush.bf16.msrb.mxu0 %v2938_v34 }
 0x17f   :  { %v956_v24 = vpop.f32.mrf.mxu2 }
 0x180   :  { %v961_v32 = vpack.c.bf16 %v956_v24, %v954_v23  ;;  %1361 = vmatpush.bf16.msrb.mxu3 %v2949_v35  ;;  %1128 = vmatpush.bf16.msrb.mxu0 %v2937_v36  ;;  %v2968_v23 = vld [vmem:[%s3735_s5 + $0x28] sm:$0xff] }
 0x182   :  { %2548 = vmatmul.msk.bf16.vlgmr.msra.gmra.mxu1 %vm459_vm2, %v961_v32 }
 0x183   :  { %1392 = vmatpush.bf16.msra.mxu1 %v2962_v54  ;;  %v2748_v54 = vld [vmem:[%s3734_s4 + $0x8] sm:$0xf] }
 0x184   :  { %1362 = vmatpush.bf16.msrb.mxu3 %v2948_v37  ;;  %1129 = vmatpush.bf16.msrb.mxu0 %v2936_v38  ;;  %v3006_v37 = vld [vmem:[%s3733_s3] ss:$0 sm:$0xff] }
 0x187   :  { %v1174_v39 = vpop.f32.mrf.mxu2  ;;  %1393 = vmatpush.bf16.msra.mxu1 %v2961_v63  ;;  %v2973_v63 = vld [vmem:[%s3735_s5 + $0x50] sm:$0xff] }
 0x188   :  { %1363 = vmatpush.bf16.msrb.mxu3 %v2947_v40  ;;  %1130 = vmatpush.bf16.msrb.mxu0 %v2935_v41  ;;  %v2966_v40 = vld [vmem:[%s3735_s5 + $0x18] sm:$0xff] }
 0x18c   :  { %1364 = vmatpush.bf16.msrb.mxu3 %v2946_v42  ;;  %1131 = vmatpush.bf16.msrb.mxu0 %v2934_v43 }
 0x18f   :  { %v1176_v45 = vpop.f32.mrf.mxu2 }
 0x190   :  { %v1207_v46 = vpack.c.bf16 %v1176_v45, %v1174_v39  ;;  %1365 = vmatpush.bf16.msrb.mxu3 %v2945_v44  ;;  %1372 = vmatpush.bf16.msra.mxu0 %v2960_v47  ;;  %v2965_v45 = vld [vmem:[%s3735_s5 + $0x10] sm:$0xff] }
 0x192   :  { %2554 = vmatmul.msk.bf16.vlgmr.msrb.gmra.mxu1 %vm163_vm1, %v2944_v0  ;;  %v2956_v0 = vld [vmem:[%s3732_s2 + $0x298] sm:$0xff] }
 0x193   :  { %1366 = vmatmul.bf16.vlgmr.msrb.gmra.mxu3 %v1207_v46 }
 0x194   :  { %1373 = vmatpush.bf16.msra.mxu0 %v2959_v49  ;;  %1591 = vmatpush.bf16.msra.mxu3 %v2970_v28  ;;  %v2978_v49 = vld [vmem:[%s3735_s5 + $0x78] sm:$0xff] }
 0x197   :  { %v1202_v55 = vpop.f32.mrf.mxu2 }
 0x198   :  { %1374 = vmatpush.bf16.msra.mxu0 %v2958_v53  ;;  %1592 = vmatpush.bf16.msra.mxu3 %v2969_v30  ;;  %v2666_v53 = vld [vmem:[%s3734_s4 + $0x4] sm:$0xf] }
 0x19c   :  { %1375 = vmatpush.bf16.msra.mxu0 %v2957_v59  ;;  %1593 = vmatpush.bf16.msra.mxu3 %v2968_v23  ;;  %v2975_v59 = vld [vmem:[%s3735_s5 + $0x60] sm:$0xff] }
 0x19d   :  { %v3007_v23 = vld [vmem:[%s3736_s6] ss:$0 sm:$0xff] }
 0x19f   :  { %v1204_v1 = vpop.f32.mrf.mxu2 }
 0x1a0   :  { %v1209_v3 = vpack.c.bf16 %v1204_v1, %v1202_v55  ;;  %1376 = vmatpush.bf16.msra.mxu0 %v2956_v0  ;;  %1594 = vmatpush.bf16.msra.mxu3 %v2967_v12  ;;  %v2977_v55 = vld [vmem:[%s3735_s5 + $0x70] sm:$0xff]  ;;  %v2972_v1 = vld [vmem:[%s3735_s5 + $0x48] sm:$0xff] }
 0x1a1   :  { %v2981_v0 = vld [vmem:[%s3735_s5 + $0x90] sm:$0xff] }
 0x1a2   :  { %2664 = vmatmul.msk.bf16.vlgmr.msra.gmra.mxu1 %vm459_vm2, %v1209_v3  ;;  %v2964_v3 = vld [vmem:[%s3735_s5 + $0x8] sm:$0xff] }
 0x1a4   :  { %1377 = vmatpush.bf16.msra.mxu0 %v2955_v5  ;;  %1595 = vmatpush.bf16.msra.mxu3 %v2966_v40  ;;  %v2963_v5 = vld [vmem:[%s3735_s5] sm:$0xff] }
 0x1a8   :  { %1596 = vmatpush.bf16.msra.mxu3 %v2965_v45  ;;  %v2799_v45 = vld [vmem:[%s3737_s7 + $0x2] sm:$0x3] }
 0x1ac   :  { %1597 = vmatpush.bf16.msra.mxu3 %v2964_v3 }
 0x1b0   :  { %1598 = vmatpush.bf16.msra.mxu3 %v2963_v5  ;;  %v1952_v5 = vld [vmem:[#allocation6 + $0x8] sm:$0xf] }
 0x1c1   :  { %v885_v48 = vpop.f32.mrf.mxu0 }
 0x1c9   :  { %v887_v58 = vpop.f32.mrf.mxu0 }
 0x1dc   :  { %v871_v50 = vpop.f32.mrf.mxu3 }
 0x1dd   :  { %v886_v51 = vadd.f32 %v885_v48, %v871_v50 }
 0x1df   :  { %v899_v52 = vpop.f32.mrf.mxu1 }
 0x1e0   :  { %v900_v56 = vadd.f32 %v899_v52, %v886_v51  ;;  %v2986_v51 = vld [vmem:[%s3735_s5 + $0xb8] sm:$0xff]  ;;  %v1411_v52 = vld [vmem:[%s3734_s4] sm:$0xf] }
 0x1e2   :  { %v904_v57 = vadd.f32 %v900_v56, %v3506_v7  ;;  %v2954_v7 = vld [vmem:[%s3732_s2 + $0x288] sm:$0xff]  ;;  %v2985_v56 = vld [vmem:[%s3735_s5 + $0xb0] sm:$0xff] }
 0x1e3   :  { %1378 = vmatpush.bf16.msra.mxu0 %v2954_v7 }
 0x1e4   :  { %v873_v60 = vpop.f32.mrf.mxu3 }
 0x1e5   :  { %v888_v61 = vadd.f32 %v887_v58, %v873_v60  ;;  %v2984_v58 = vld [vmem:[%s3735_s5 + $0xa8] sm:$0xff]  ;;  %v2983_v60 = vld [vmem:[%s3735_s5 + $0xa0] sm:$0xff] }
 0x1e7   :  { %v901_v62 = vpop.f32.mrf.mxu1  ;;  %1379 = vmatpush.bf16.msra.mxu0 %v2953_v8 }
 0x1e8   :  { %v902_v2 = vadd.f32 %v901_v62, %v888_v61  ;;  %v2974_v61 = vld [vmem:[%s3735_s5 + $0x58] sm:$0xff] }
 0x1e9   :  { %v2982_v62 = vld [vmem:[%s3735_s5 + $0x98] sm:$0xff] }
 0x1ea   :  { %v905_v4 = vadd.f32 %v902_v2, %v3511_v18  ;;  %v2971_v2 = vld [vmem:[%s3735_s5 + $0x40] sm:$0xff] }
 0x1ef   :  { %v940_v6 = vpop.f32.mrf.mxu1 }
 0x1f5   :  { %v1119_v20 = vpop.f32.mrf.mxu3 }
 0x1f7   :  { %v942_v9 = vpop.f32.mrf.mxu1 }
 0x1f8   :  { %v960_v10 = vpack.c.bf16 %v942_v9, %v940_v6  ;;  %v2979_v6 = vld [vmem:[%s3735_s5 + $0x80] sm:$0xff] }
 0x1fa   :  { %1132 = vmatmul.bf16.vlgmr.msrb.gmra.mxu0 %v960_v10 }
 0x1fd   :  { %v1121_v26 = vpop.f32.mrf.mxu3 }
 0x1ff   :  { %v1147_v13 = vpop.f32.mrf.mxu1 }
 0x207   :  { %v1149_v14 = vpop.f32.mrf.mxu1 }
 0x20f   :  { %v1188_v15 = vpop.f32.mrf.mxu1 }
 0x216   :  { %v1367_v29 = vpop.f32.mrf.mxu3 }
 0x217   :  { %v1190_v18 = vpop.f32.mrf.mxu1 }
 0x218   :  { %v1208_v19 = vpack.c.bf16 %v1190_v18, %v1188_v15 }
 0x21a   :  { %1380 = vmatmul.bf16.vlgmr.msra.gmra.mxu0 %v1208_v19 }
 0x21e   :  { %v1369_v34 = vpop.f32.mrf.mxu3 }
 0x21f   :  { %v1395_v11 = vpop.f32.mrf.mxu1 }
 0x227   :  { %v1397_v39 = vpop.f32.mrf.mxu1 }
 0x277   :  { %v1133_v21 = vpop.f32.mrf.mxu0 }
 0x278   :  { %v1134_v33 = vadd.f32 %v1133_v21, %v1119_v20  ;;  %v1768_v20 = vld [vmem:[#allocation4 + $0x34] sm:$0xf] }
 0x279   :  { %v1782_v21 = vunpack.c.l.b16 %v1768_v20 }
 0x27a   :  { %v1148_v24 = vadd.f32 %v1147_v13, %v1134_v33 }
 0x27c   :  { %v1152_v17 = vadd.f32 %v1148_v24, %v904_v57  ;;  %v2976_v57 = vld [vmem:[%s3735_s5 + $0x68] sm:$0xff]  ;;  %v1741_v24 = vld [vmem:[#allocation4 + $0x18] sm:$0xf] }
 0x27f   :  { %v1135_v27 = vpop.f32.mrf.mxu0 }
 0x280   :  { %v1136_v32 = vadd.f32 %v1135_v27, %v1121_v26  ;;  %v1786_v27 = vpack.c.b16 %v1782_v21, %v1782_v21 }
 0x282   :  { %v1150_v25 = vadd.f32 %v1149_v14, %v1136_v32  ;;  %v1795_v28 = vsel %vm1715_vm4, %v1786_v27, 0 }
 0x283   :  { %1801 = vmatpush.bf16.msrb.mxu3 %v1795_v28  ;;  %v1925_v28 = vld [vmem:[%s3740_s10] sm:$0x1] }
 0x284   :  { %v1153_v41 = vadd.f32 %v1150_v25, %v905_v4  ;;  %v2980_v4 = vld [vmem:[%s3735_s5 + $0x88] sm:$0xff] }
 0x297   :  { %v1381_v16 = vpop.f32.mrf.mxu0 }
 0x298   :  { %v1382_v22 = vadd.f32 %v1381_v16, %v1367_v29  ;;  %v2992_v29 = vld [vmem:[#allocation4 + $0x2c] sm:$0xff] }
 0x299   :  { %1802 = vmatpush.bf16.msrb.mxu3 %v2992_v29  ;;  %v1876_v16 = vld [vmem:[#allocation4 + $0x50] sm:$0xf]  ;;  %v2843_v29 = vld [vmem:[%s3740_s10 + $0x1] sm:$0x1] }
 0x29a   :  { %v1396_v31 = vadd.f32 %v1395_v11, %v1382_v22  ;;  %v1890_v12 = vunpack.c.l.b16 %v1876_v16  ;;  %v2996_v16 = vld [vmem:[#allocation6] sm:$0xff] }
 0x29c   :  { %v1400_v36 = vadd.f32 %v1396_v31, %v1152_v17  ;;  %v1823_v17 = vunpack.c.l.b16 %v1741_v24  ;;  %v2997_v24 = vld [vmem:[#allocation6 + $0xc] sm:$0xff] }
 0x29e   :  { %v1406_v43 = vadd.f32 %v3006_v37, %v1400_v36  ;;  %v1827_v40 = vpack.c.b16 %v1823_v17, %v1823_v17 }
 0x29f   :  { %v1383_v35 = vpop.f32.mrf.mxu0 }
 0x2a0   :  { %v1384_v38 = vadd.f32 %v1383_v35, %v1369_v34  ;;  %v1408_v47 = vmax.f32 %v1406_v43, 0.0  ;;  %v3117_v34 = vmov 65535  }
 0x2a1   :  { %v1716_v35 = vsel %vm1714_vm5, 4294967295, %v3117_v34 }
 0x2a2   :  { %v1398_v42 = vadd.f32 %v1397_v39, %v1384_v38  ;;  %v1717_v39 = vsel %vm1715_vm4, %v1716_v35, 0 }
 0x2a4   :  { %v1401_v44 = vadd.f32 %v1398_v42, %v1153_v41 }
 0x2a6   :  { %v1407_v46 = vadd.f32 %v3006_v37, %v1401_v44  ;;  %v1894_v37 = vpack.c.b16 %v1890_v12, %v1890_v12  ;;  %v1835_v44 = vsel %vm1715_vm4, %v1827_v40, 0 }
 0x2a8   :  { %v1409_v48 = vmax.f32 %v1407_v46, 0.0  ;;  %v1902_v43 = vsel %vm1715_vm4, %v1894_v37, 0  ;;  %v1709_v46 = vld [vmem:[%s3737_s7] sm:$0x3] }
 0x2aa   :  { %v1410_v50 = vpack.c.bf16 %v1409_v48, %v1408_v47  ;;  %v2827_v47 = vld [vmem:[%s3737_s7 + $0x4] sm:$0x3] }
 0x2ab   :  { %v2995_v48 = vld [vmem:[#allocation4 + $0x48] sm:$0xff] }
 0x2ac   :  { %1423 = vmatpush.bf16.msra.mxu2 %v1410_v50  ;;  %1458 = vmatpush.bf16.msrb.mxu1 %v1410_v50 }
 0x2ad   :  { %1616 = vmatpush.bf16.msrb.mxu0 %v1410_v50  ;;  %v2994_v50 = vld [vmem:[#allocation4 + $0x40] sm:$0xff] }
 0x2af   :  { %2665 = vmatmul.msk.bf16.vlgmr.msra.gmra.mxu2 %vm1412_vm3, %v1411_v52  ;;  %2667 = vmatmul.msk.bf16.vlgmr.msrb.gmra.mxu1 %vm1412_vm3, %v2666_v53  ;;  %v2993_v52 = vld [vmem:[#allocation4 + $0x38] sm:$0xff]  ;;  %v2991_v53 = vld [vmem:[#allocation4 + $0x24] sm:$0xff] }
 0x2b0   :  { %1530 = vmatpush.bf16.msrb.mxu2 %v2978_v49  ;;  %1688 = vmatpush.bf16.msra.mxu1 %v2986_v51  ;;  %v2989_v49 = vld [vmem:[#allocation4 + $0x10] sm:$0xff]  ;;  %v2988_v51 = vld [vmem:[#allocation4 + $0x8] sm:$0xff] }
 0x2b1   :  { %2749 = vmatmul.msk.bf16.vlgmr.msrb.gmra.mxu0 %vm1412_vm3, %v2748_v54  ;;  %1803 = vmatpush.bf16.msrb.mxu3 %v2991_v53  ;;  %v2987_v54 = vld [vmem:[#allocation4] sm:$0xff] }
 0x2b4   :  { %1531 = vmatpush.bf16.msrb.mxu2 %v2977_v55  ;;  %1689 = vmatpush.bf16.msra.mxu1 %v2985_v56  ;;  %v2990_v55 = vld [vmem:[#allocation4 + $0x1c] sm:$0xff] }
 0x2b5   :  { %1804 = vmatpush.bf16.msrb.mxu3 %v2990_v55 }
 0x2b8   :  { %1532 = vmatpush.bf16.msrb.mxu2 %v2976_v57  ;;  %1690 = vmatpush.bf16.msra.mxu1 %v2984_v58 }
 0x2bc   :  { %1533 = vmatpush.bf16.msrb.mxu2 %v2975_v59  ;;  %1691 = vmatpush.bf16.msra.mxu1 %v2983_v60 }
 0x2c0   :  { %1534 = vmatpush.bf16.msrb.mxu2 %v2974_v61  ;;  %1692 = vmatpush.bf16.msra.mxu1 %v2982_v62 }
 0x2c4   :  { %1535 = vmatpush.bf16.msrb.mxu2 %v2973_v63  ;;  %1693 = vmatpush.bf16.msra.mxu1 %v2981_v0 }
 0x2c8   :  { %1536 = vmatpush.bf16.msrb.mxu2 %v2972_v1  ;;  %1694 = vmatpush.bf16.msra.mxu1 %v2980_v4 }
 0x2cc   :  { %1537 = vmatpush.bf16.msrb.mxu2 %v2971_v2  ;;  %1695 = vmatpush.bf16.msra.mxu1 %v2979_v6 }
 0x32c   :  { %v1460_v7 = vpop.f32.mrf.mxu1 }
 0x32d   :  { %v1464_v8 = vpack.c.bf16 %v1460_v7, %v1460_v7  ;;  %v3008_v7 = vld [vmem:[%s3739_s9] ss:$0 sm:$0xff] }
 0x32e   :  { %v1618_v9 = vpop.f32.mrf.mxu0 }
 0x32f   :  { %v1622_v10 = vpack.c.bf16 %v1618_v9, %v1618_v9  ;;  %1538 = vmatmul.bf16.vlgmr.msrb.gmra.mxu2 %v1464_v8  ;;  %v2010_v8 = vunpack.c.l.b16 %v1952_v5 }
 0x331   :  { %1696 = vmatmul.bf16.vlgmr.msra.gmra.mxu1 %v1622_v10 }
 0x332   :  { %v1425_v13 = vpop.f32.mrf.mxu2 }
 0x333   :  { %v1429_v14 = vpack.c.bf16 %v1425_v13, %v1425_v13  ;;  %v2012_v13 = vpack.c.b16 %v2010_v8, %v2010_v8 }
 0x334   :  { %v1462_v15 = vpop.f32.mrf.mxu1 }
 0x335   :  { %1599 = vmatmul.bf16.vlgmr.msra.gmra.mxu3 %v1429_v14  ;;  %v1931_v15 = vsel %vm1930_vm8, 4294967295, %v3117_v34 }
 0x336   :  { %v1620_v18 = vpop.f32.mrf.mxu0  ;;  %v1932_v21 = vsel %vm167_vm0, %v1931_v15, 0 }
 0x337   :  { %v2018_v18 = vsel %vm1715_vm4, %v2012_v13, 0 }
 0x33a   :  { %v1427_v19 = vpop.f32.mrf.mxu2 }
 0x3ae   :  { %v1697_v26 = vpop.f32.mrf.mxu1 }
 0x3b2   :  { %v1539_v30 = vpop.f32.mrf.mxu2 }
 0x3b6   :  { %v1699_v33 = vpop.f32.mrf.mxu1 }
 0x3b7   :  { %v1975_v33 = vld [vmem:[#allocation6 + $0x14] sm:$0xf] }
 0x3b8   :  { %v1600_v11 = vpop.f32.mrf.mxu3 }
 0x3b9   :  { %v1601_v22 = vadd.f32 %v1600_v11, %v1539_v30  ;;  %v2855_v30 = vld [vmem:[%s3740_s10 + $0x2] sm:$0x1]  ;;  %v1981_v11 = vunpack.c.l.b16 %v1975_v33 }
 0x3ba   :  { %v1541_v32 = vpop.f32.mrf.mxu2 }
 0x3bb   :  { %v1701_v31 = vadd.f32 %v1697_v26, %v1601_v22  ;;  %v1983_v22 = vpack.c.b16 %v1981_v11, %v1981_v11  ;;  %v2055_v32 = vld [vmem:[#allocation6 + $0x20] sm:$0xf] }
 0x3bd   :  { %v1706_v25 = vadd.f32 %v3007_v23, %v1701_v31  ;;  %v1990_v23 = vsel %vm1715_vm4, %v1983_v22, 0  ;;  %v2061_v31 = vunpack.c.l.b16 %v2055_v32 }
 0x3bf   :  { %v1707_v36 = vmax.f32 %v1706_v25, 0.0  ;;  %v2063_v12 = vpack.c.b16 %v2061_v31, %v2061_v31  ;;  %v2998_v25 = vld [vmem:[#allocation6 + $0x18] sm:$0xff] }
 0x3c0   :  { %v1602_v38 = vpop.f32.mrf.mxu3 }
 0x3c1   :  { %v1708_v41 = vpack.c.bf16 %v1707_v36, %v1707_v36  ;;  %v2069_v17 = vsel %vm1715_vm4, %v2063_v12, 0 }
 0x3c3   :  { %v1719_v42 = vand.u32 %v1717_v39, %v1708_v41 }
 0x3c5   :  { %1728 = vmatpush.bf16.msra.mxu0 %v1719_v42  ;;  %1754 = vmatpush.bf16.msra.mxu2 %v1719_v42 }
 0x3c6   :  { %1862 = vmatpush.bf16.msrb.mxu1 %v1719_v42 }
 0x3c8   :  { %2800 = vmatmul.msk.bf16.vlgmr.msra.gmra.mxu2 %vm1710_vm6, %v2799_v45  ;;  %2798 = vmatmul.msk.bf16.vlgmr.msra.gmra.mxu0 %vm1710_vm6, %v1709_v46 }
 0x3c9   :  { %1908 = vmatpush.bf16.msrb.mxu2 %v1902_v43  ;;  %1841 = vmatpush.bf16.msrb.mxu0 %v1835_v44 }
 0x3ca   :  { %2828 = vmatmul.msk.bf16.vlgmr.msrb.gmra.mxu1 %vm1710_vm6, %v2827_v47 }
 0x3cb   :  { %1998 = vmatpush.bf16.msra.mxu1 %v1990_v23 }
 0x3cd   :  { %1909 = vmatpush.bf16.msrb.mxu2 %v2995_v48  ;;  %1842 = vmatpush.bf16.msrb.mxu0 %v2989_v49  ;;  %v2085_v49 = vld [vmem:[#allocation7] sm:$0x1] }
 0x3cf   :  { %1999 = vmatpush.bf16.msra.mxu1 %v2997_v24 }
 0x3d1   :  { %1910 = vmatpush.bf16.msrb.mxu2 %v2994_v50  ;;  %1843 = vmatpush.bf16.msrb.mxu0 %v2988_v51 }
 0x3d5   :  { %1911 = vmatpush.bf16.msrb.mxu2 %v2993_v52  ;;  %1844 = vmatpush.bf16.msrb.mxu0 %v2987_v54 }
 0x3d9   :  { %2026 = vmatpush.bf16.msra.mxu2 %v2018_v18 }
 0x3dd   :  { %2027 = vmatpush.bf16.msra.mxu2 %v2996_v16 }
 0x445   :  { %v1730_v56 = vpop.f32.mrf.mxu0 }
 0x446   :  { %v1734_v58 = vpack.c.bf16 %v1730_v56, %v1730_v56 }
 0x447   :  { %v1864_v57 = vpop.f32.mrf.mxu1 }
 0x448   :  { %v1868_v59 = vpack.c.bf16 %v1864_v57, %v1864_v57  ;;  %2826 = vmatmul.msk.bf16.vlgmr.msrb.gmra.mxu0 %vm1790_vm7, %v1734_v58 }
 0x44a   :  { %2841 = vmatmul.msk.bf16.vlgmr.msrb.gmra.mxu2 %vm1790_vm7, %v1868_v59 }
 0x44b   :  { %v1756_v60 = vpop.f32.mrf.mxu2 }
 0x44c   :  { %v1760_v61 = vpack.c.bf16 %v1756_v60, %v1756_v60 }
 0x44d   :  { %v1732_v62 = vpop.f32.mrf.mxu0 }
 0x44e   :  { %2813 = vmatmul.msk.bf16.vlgmr.msrb.gmra.mxu3 %vm1790_vm7, %v1760_v61 }
 0x44f   :  { %v1866_v63 = vpop.f32.mrf.mxu1 }
 0x453   :  { %v1758_v0 = vpop.f32.mrf.mxu2 }
 0x4c5   :  { %v1846_v1 = vpop.f32.mrf.mxu0 }
 0x4cd   :  { %v1913_v2 = vpop.f32.mrf.mxu2  ;;  %v1848_v3 = vpop.f32.mrf.mxu0 }
 0x4d1   :  { %v1806_v4 = vpop.f32.mrf.mxu3 }
 0x4d2   :  { %v1847_v6 = vadd.f32 %v1846_v1, %v1806_v4 }
 0x4d4   :  { %v1917_v9 = vadd.f32 %v1913_v2, %v1847_v6 }
 0x4d5   :  { %v1915_v10 = vpop.f32.mrf.mxu2 }
 0x4d6   :  { %v1922_v14 = vadd.f32 %v3008_v7, %v1917_v9 }
 0x4d8   :  { %v1923_v19 = vmax.f32 %v1922_v14, 0.0 }
 0x4d9   :  { %v1808_v20 = vpop.f32.mrf.mxu3 }
 0x4da   :  { %v1924_v26 = vpack.c.bf16 %v1923_v19, %v1923_v19 }
 0x4dc   :  { %v1934_v27 = vand.u32 %v1932_v21, %v1924_v26 }
 0x4de   :  { %1943 = vmatpush.bf16.msra.mxu3 %v1934_v27  ;;  %1965 = vmatpush.bf16.msra.mxu0 %v1934_v27 }
 0x4e1   :  { %2842 = vmatmul.msk.bf16.vlgmr.msra.gmra.mxu3 %vm1926_vm9, %v1925_v28  ;;  %2844 = vmatmul.msk.bf16.vlgmr.msra.gmra.mxu0 %vm1926_vm9, %v2843_v29 }
 0x4e2   :  { %2045 = vmatpush.bf16.msrb.mxu3 %v1934_v27  ;;  %2077 = vmatpush.bf16.msrb.mxu0 %v2069_v17 }
 0x4e6   :  { %2078 = vmatpush.bf16.msrb.mxu0 %v2998_v25 }
 0x4f1   :  { %2856 = vmatmul.msk.bf16.vlgmr.msrb.gmra.mxu3 %vm1926_vm9, %v2855_v30 }
 0x55e   :  { %v1967_v34 = vpop.f32.mrf.mxu0 }
 0x55f   :  { %v1971_v35 = vpack.c.bf16 %v1967_v34, %v1967_v34 }
 0x561   :  { %2849 = vmatmul.msk.bf16.vlgmr.msra.gmra.mxu1 %vm1985_vm10, %v1971_v35 }
 0x564   :  { %v1945_v36 = vpop.f32.mrf.mxu3 }
 0x565   :  { %v1949_v37 = vpack.c.bf16 %v1945_v36, %v1945_v36 }
 0x566   :  { %v1969_v38 = vpop.f32.mrf.mxu0 }
 0x567   :  { %2854 = vmatmul.msk.bf16.vlgmr.msra.gmra.mxu2 %vm1985_vm10, %v1949_v37 }
 0x56c   :  { %v1947_v39 = vpop.f32.mrf.mxu3 }
 0x574   :  { %v2047_v40 = vpop.f32.mrf.mxu3 }
 0x575   :  { %v2051_v41 = vpack.c.bf16 %v2047_v40, %v2047_v40 }
 0x577   :  { %2861 = vmatmul.msk.bf16.vlgmr.msrb.gmra.mxu0 %vm1985_vm10, %v2051_v41 }
 0x57c   :  { %v2049_v42 = vpop.f32.mrf.mxu3 }
 0x5de   :  { %v2001_v43 = vpop.f32.mrf.mxu1 }
 0x5e6   :  { %v2003_v44 = vpop.f32.mrf.mxu1 }
 0x5ea   :  { %v2029_v45 = vpop.f32.mrf.mxu2 }
 0x5eb   :  { %v2030_v47 = vadd.f32 %v2029_v45, %v2001_v43 }
 0x5f2   :  { %v2031_v46 = vpop.f32.mrf.mxu2 }
 0x5f4   :  { %v2080_v48 = vpop.f32.mrf.mxu0 }
 0x5f5   :  { %v2084_v50 = vadd.f32 %v2080_v48, %v2030_v47 }
 0x5f7   :  { %v2086_v51 = vadd.f32 %v2085_v49, %v2084_v50 }
 0x5f9   :  { %v2087_v52 = vmax.f32 %v2086_v51, 0.0 }
 0x5fb   :  { %2089 = vst.msk [vmem:[%s3743_s13] sm:$0x1] %vm2088_vm11, %v2087_v52 }
 0x5fc   :  { %v2082_v53 = vpop.f32.mrf.mxu0 }
 0x5fd   :  { %2094 = vsyncpa [#allocation3], 1 }
 0x5fe   :  { %2095 = vsyncpa [#allocation5], 1 }
 0x5ff   :  { %2096 = vsyncpa [#allocation8], 1 }

</bundles_post_ra>
